<compile_context>
chip_gen: v6e
topology: v6e:2x2x1
jax: 0.10.0
libtpu: 0.0.40
codegen_flags: <defaults>
</compile_context>

<pallas_src>
import math

import jax
import jax.numpy as jnp
from jax.experimental import pallas as pl
from jax.experimental.pallas import tpu as pltpu

# Model hyper-parameters (small, consistent with Transformer(vocab, vector_size, seq_len))
VOCAB = 64           # vocab_size
VOCAB_PAD = 128      # lane-dense padded vocab / padded feature width
D = 32               # vector_size
SEQ = 8              # sequence_length
H = 4                # attention heads
DH = D // H          # per-head dim
FFN = 64             # feed-forward hidden dim
B = 2                # batch
# NOTE: SEQ, DH and B*SEQ must be powers of two (masks below use shift/and tricks).

# --------------------------- packed-slab layout ------------------------------
# Matmul weights: bf16 slab [NW, 128, 128], each weight zero-padded to 128x128.
W_EMB_ENC, W_EMB_DEC = 0, 1
W_E_QKV, W_E_O, W_E_FF1, W_E_FF2 = 2, 3, 4, 5
W_D_QKV, W_D_O = 6, 7
W_C_Q, W_C_KV, W_C_O = 8, 9, 10
W_D_FF1, W_D_FF2, W_OUT = 11, 12, 13
NW = 14

# Vector params: f32 slab [NP, 128], one zero-padded row per vector.
(P_E_BQKV, P_E_BO, P_E_LN1G, P_E_LN1B, P_E_BFF1, P_E_BFF2, P_E_LN2G, P_E_LN2B,
 P_D_BQKV, P_D_BO, P_D_LN1G, P_D_LN1B, P_C_BQ, P_C_BKV, P_C_BO,
 P_D_LN2G, P_D_LN2B, P_D_BFF1, P_D_BFF2, P_D_LN3G, P_D_LN3B, P_B_OUT) = range(22)
P_POS_ENC = 24       # rows 24..31  (8-aligned so slab slices stay sublane-aligned)
P_POS_DEC = 32       # rows 32..39
NP = 40


# ------------------------------ fused kernel --------------------------------

def _transformer_kernel(tok_ref, w_ref, p_ref, out_ref):
    n = tok_ref.shape[0]          # B * SEQ rows (batch folded into M)
    nb = n // SEQ
    nr = H * n                    # all (head, batch, query) score rows at once
    f32, bf16 = jnp.float32, jnp.bfloat16
    sh_n = n.bit_length() - 1
    sh_s = SEQ.bit_length() - 1
    sh_dh = DH.bit_length() - 1

    pvals = p_ref[...]            # [NP, 128] f32 — only 5 vregs, keep resident

    def prow(i):                  # [1, 128] broadcastable param row
        return pvals[i:i + 1, :]

    def wmat(i):                  # [128, 128] bf16 weight (static slab index)
        return w_ref[i]

    def dense(x, wi, bi, relu=False):
        y = jnp.dot(x.astype(bf16), wmat(wi), preferred_element_type=f32) + prow(bi)
        return jnp.maximum(y, 0.0) if relu else y

    col_ids = jax.lax.broadcasted_iota(jnp.int32, (n, 128), 1)
    feat = col_ids < D            # real feature lanes (pads stay exactly zero)

    def layer_norm(x, gi, bi):
        mu = jnp.sum(x, axis=-1, keepdims=True) * (1.0 / D)
        diff = jnp.where(feat, x - mu, 0.0)
        var = jnp.sum(diff * diff, axis=-1, keepdims=True) * (1.0 / D)
        return diff * jax.lax.rsqrt(var + 1e-5) * prow(gi) + prow(bi)

    # -------- masks for the fused all-heads attention (built once, no DMA) ---
    head_r = jnp.right_shift(jax.lax.broadcasted_iota(jnp.int32, (nr, D), 0), sh_n)
    head_c = jnp.right_shift(jax.lax.broadcasted_iota(jnp.int32, (nr, D), 1), sh_dh)
    head_mask = head_r == head_c                                     # [nr, D]
    row_ids = jax.lax.broadcasted_iota(jnp.int32, (nr, n), 0)
    key_ids = jax.lax.broadcasted_iota(jnp.int32, (nr, n), 1)
    same_batch = (jnp.right_shift(jnp.bitwise_and(row_ids, n - 1), sh_s)
                  == jnp.right_shift(key_ids, sh_s))                 # [nr, n]
    causal_ok = (jnp.bitwise_and(key_ids, SEQ - 1)
                 <= jnp.bitwise_and(row_ids, SEQ - 1))               # [nr, n]
    scale = 1.0 / math.sqrt(DH)

    def attention(q, k, v, wo_i, bo_i, causal):
        # q/k/v: [n, D] f32.  Queries replicated per head and masked to that head's
        # feature columns -> ONE scores matmul for all heads and all batch rows.
        q_bd = jnp.where(head_mask, jnp.concatenate([q] * H, axis=0), 0.0)   # [nr, D]
        s = jax.lax.dot_general(q_bd.astype(bf16), k.astype(bf16),
                                (((1,), (1,)), ((), ())),
                                preferred_element_type=f32) * scale          # [nr, n]
        valid = jnp.logical_and(same_batch, causal_ok) if causal else same_batch
        s = jnp.where(valid, s, -1e30)
        s = s - jnp.max(s, axis=-1, keepdims=True)
        probs = jnp.exp(s)
        probs = probs * pl.reciprocal(jnp.sum(probs, axis=-1, keepdims=True),
                                      approx=True)
        ctx = jnp.where(head_mask,
                        jnp.dot(probs.astype(bf16), v.astype(bf16),
                                preferred_element_type=f32), 0.0)            # [nr, D]
        acc = ctx[0:n, :]
        for h in range(1, H):                      # fold heads (masked => concat)
            acc = acc + ctx[h * n:(h + 1) * n, :]
        return jnp.dot(acc.astype(bf16), w_ref[wo_i, 0:D, :],
                       preferred_element_type=f32) + prow(bo_i)              # [n, 128]

    # ----------------------- embedding (in-kernel, one-hot) ------------------
    tok = tok_ref[...]                                                       # [n, 1] i32
    one_hot = (col_ids == tok).astype(bf16)                                  # [n, 128]
    pos_e = jnp.concatenate([pvals[P_POS_ENC:P_POS_ENC + SEQ, :]] * nb, axis=0)
    pos_d = jnp.concatenate([pvals[P_POS_DEC:P_POS_DEC + SEQ, :]] * nb, axis=0)
    x = jnp.dot(one_hot, wmat(W_EMB_ENC), preferred_element_type=f32) + pos_e
    yd = jnp.dot(one_hot, wmat(W_EMB_DEC), preferred_element_type=f32) + pos_d

    # ------------------------------- encoder ---------------------------------
    qkv = dense(x, W_E_QKV, P_E_BQKV)
    attn = attention(qkv[:, 0:D], qkv[:, D:2 * D], qkv[:, 2 * D:3 * D],
                     W_E_O, P_E_BO, causal=False)
    x = layer_norm(x + attn, P_E_LN1G, P_E_LN1B)
    ff = dense(dense(x, W_E_FF1, P_E_BFF1, relu=True), W_E_FF2, P_E_BFF2)
    hidden = layer_norm(x + ff, P_E_LN2G, P_E_LN2B)     # encoder output stays in VMEM

    # ------------------------------- decoder ---------------------------------
    qkv_d = dense(yd, W_D_QKV, P_D_BQKV)
    sa = attention(qkv_d[:, 0:D], qkv_d[:, D:2 * D], qkv_d[:, 2 * D:3 * D],
                   W_D_O, P_D_BO, causal=True)
    yd = layer_norm(yd + sa, P_D_LN1G, P_D_LN1B)

    qc = dense(yd, W_C_Q, P_C_BQ)[:, 0:D]
    kv = dense(hidden, W_C_KV, P_C_BKV)
    ca = attention(qc, kv[:, 0:D], kv[:, D:2 * D], W_C_O, P_C_BO, causal=False)
    yd = layer_norm(yd + ca, P_D_LN2G, P_D_LN2B)

    ff = dense(dense(yd, W_D_FF1, P_D_BFF1, relu=True), W_D_FF2, P_D_BFF2)
    yd = layer_norm(yd + ff, P_D_LN3G, P_D_LN3B)

    # lane-dense (128-wide) logits store; real vocab occupies cols 0:VOCAB
    out_ref[...] = dense(yd, W_OUT, P_B_OUT)


# ------------------------------ model wrapper --------------------------------

def transformer_forward(packed, tokens):
    batch, seq = tokens.shape
    assert seq == SEQ
    n = batch * seq
    assert n & (n - 1) == 0, "B*SEQ must be a power of two for the in-kernel masks"
    tok2d = tokens.reshape(n, 1).astype(jnp.int32)

    logits = pl.pallas_call(
        _transformer_kernel,
        out_shape=jax.ShapeDtypeStruct((n, VOCAB_PAD), jnp.float32),
        grid=(1,),
        in_specs=[
            pl.BlockSpec((n, 1), lambda i: (0, 0)),
            pl.BlockSpec((NW, 128, 128), lambda i: (0, 0, 0)),
            pl.BlockSpec((NP, 128), lambda i: (0, 0)),
        ],
        out_specs=pl.BlockSpec((n, VOCAB_PAD), lambda i: (0, 0)),
        compiler_params=pltpu.CompilerParams(
            dimension_semantics=("arbitrary",)),
    )(tok2d, packed["w"], packed["p"])

    return logits.reshape(batch, seq, VOCAB_PAD)[:, :, :VOCAB]


# --------------------------- one-time host-side packing ----------------------

def pack_params(params):
    """Pack all weights into one bf16 matmul slab + one f32 vector slab (done once)."""
    enc, dec = params["enc"], params["dec"]
    emb_scale = math.sqrt(D)

    def pad_mat(w):
        r, c = w.shape
        return jnp.pad(w, ((0, 128 - r), (0, 128 - c)))

    mats = [
        params["embed_enc"] * emb_scale, params["embed_dec"] * emb_scale,
        enc["wqkv"], enc["wo"], enc["w1"], enc["w2"],
        dec["wqkv"], dec["wo"],
        dec["c_wq"], dec["c_wkv"], dec["c_wo"],
        dec["w1"], dec["w2"], dec["w_out"],
    ]
    w_slab = jnp.stack([pad_mat(m) for m in mats]).astype(jnp.bfloat16)

    def pad_vec(v):
        return jnp.pad(v, (0, 128 - v.shape[0]))

    rows = [
        enc["bqkv"], enc["bo"], enc["ln1_g"], enc["ln1_b"],
        enc["b1"], enc["b2"], enc["ln2_g"], enc["ln2_b"],
        dec["bqkv"], dec["bo"], dec["ln1_g"], dec["ln1_b"],
        dec["c_bq"], dec["c_bkv"], dec["c_bo"],
        dec["ln2_g"], dec["ln2_b"],
        dec["b1"], dec["b2"], dec["ln3_g"], dec["ln3_b"],
        dec["b_out"],
    ]
    vec_rows = jnp.stack([pad_vec(v) for v in rows])                   # rows 0..21
    gap = jnp.zeros((P_POS_ENC - len(rows), 128), jnp.float32)         # rows 22..23
    pos_e = jnp.pad(params["pos_enc"], ((0, 0), (0, 128 - D)))         # rows 24..31
    pos_d = jnp.pad(params["pos_dec"], ((0, 0), (0, 128 - D)))         # rows 32..39
    p_slab = jnp.concatenate([vec_rows, gap, pos_e, pos_d],
                             axis=0).astype(jnp.float32)

    assert w_slab.shape == (NW, 128, 128)
    assert p_slab.shape == (NP, 128)
    return {"w": w_slab, "p": p_slab}


# ----------------------------- parameter init --------------------------------

def init_params(key):
    keys = iter(jax.random.split(key, 24))

    def dense_init(din, dout):
        w = jax.random.normal(next(keys), (din, dout), jnp.float32) * 0.02
        return w, jnp.zeros((dout,), jnp.float32)

    ones = jnp.ones((D,), jnp.float32)
    zeros = jnp.zeros((D,), jnp.float32)

    e_wqkv, e_bqkv = dense_init(D, 3 * D)
    e_wo, e_bo = dense_init(D, D)
    e_w1, e_b1 = dense_init(D, FFN)
    e_w2, e_b2 = dense_init(FFN, D)

    d_wqkv, d_bqkv = dense_init(D, 3 * D)
    d_wo, d_bo = dense_init(D, D)
    c_wq, c_bq = dense_init(D, D)
    c_wkv, c_bkv = dense_init(D, 2 * D)
    c_wo, c_bo = dense_init(D, D)
    d_w1, d_fb1 = dense_init(D, FFN)
    d_w2, d_fb2 = dense_init(FFN, D)
    w_out, b_out = dense_init(D, VOCAB)

    return {
        "embed_enc": jax.random.normal(next(keys), (VOCAB, D), jnp.float32) * 0.02,
        "pos_enc": jax.random.normal(next(keys), (SEQ, D), jnp.float32) * 0.02,
        "embed_dec": jax.random.normal(next(keys), (VOCAB, D), jnp.float32) * 0.02,
        "pos_dec": jax.random.normal(next(keys), (SEQ, D), jnp.float32) * 0.02,
        "enc": {
            "wqkv": e_wqkv, "bqkv": e_bqkv, "wo": e_wo, "bo": e_bo,
            "ln1_g": ones, "ln1_b": zeros,
            "w1": e_w1, "b1": e_b1, "w2": e_w2, "b2": e_b2,
            "ln2_g": ones, "ln2_b": zeros,
        },
        "dec": {
            "wqkv": d_wqkv, "bqkv": d_bqkv, "wo": d_wo, "bo": d_bo,
            "ln1_g": ones, "ln1_b": zeros,
            "c_wq": c_wq, "c_bq": c_bq, "c_wkv": c_wkv, "c_bkv": c_bkv,
            "c_wo": c_wo, "c_bo": c_bo,
            "ln2_g": ones, "ln2_b": zeros,
            "w1": d_w1, "b1": d_fb1, "w2": d_w2, "b2": d_fb2,
            "ln3_g": ones, "ln3_b": zeros,
            "w_out": w_out, "b_out": b_out,
        },
    }


# --------------------------------- main ---------------------------------------

if __name__ == "__main__":
    key = jax.random.PRNGKey(0)
    pkey, tkey = jax.random.split(key)
    params = init_params(pkey)
    packed = pack_params(params)     # one-time pack + bf16 cast of all weights
    tokens = jax.random.randint(tkey, (B, SEQ), 0, VOCAB, dtype=jnp.int32)

    out = jax.jit(transformer_forward)(packed, tokens)
    out = jax.block_until_ready(out)

    assert out.shape == (B, SEQ, VOCAB), out.shape
    assert bool(jnp.all(jnp.isfinite(out)))
    print("KERNEL_OK")
</pallas_src>

<mosaic_0001>
module attributes {stable_mosaic.version = 11 : i64} {
  func.func @_transformer_kernel(%arg0: i32, %arg1: memref<16x1xi32, #tpu.memory_space<vmem>>, %arg2: memref<14x128x128xbf16, #tpu.memory_space<vmem>>, %arg3: memref<40x128xf32, #tpu.memory_space<vmem>>, %arg4: memref<16x128xf32, #tpu.memory_space<vmem>>) attributes {dimension_semantics = [#tpu.dimension_semantics<arbitrary>], iteration_bounds = array<i64: 1>, scalar_prefetch = 0 : i64, scratch_operands = 0 : i64, tpu.core_type = #tpu.core_type<tc>, window_params = [{pipeline_mode = #tpu.pipeline_mode<synchronous>, transform_indices = @transform_0, window_bounds = array<i64: 16, 1>}, {pipeline_mode = #tpu.pipeline_mode<synchronous>, transform_indices = @transform_1, window_bounds = array<i64: 14, 128, 128>}, {pipeline_mode = #tpu.pipeline_mode<synchronous>, transform_indices = @transform_2, window_bounds = array<i64: 40, 128>}, {pipeline_mode = #tpu.pipeline_mode<synchronous>, transform_indices = @transform_3, window_bounds = array<i64: 16, 128>}]} {
    %c0 = arith.constant 0 : index
    %c0_0 = arith.constant 0 : index
    %0 = vector.load %arg3[%c0, %c0_0] : memref<40x128xf32, #tpu.memory_space<vmem>>, vector<40x128xf32>
    %1 = tpu.iota {dimensions = array<i32: 1>} : vector<16x128xi32>
    %c32_i32 = arith.constant 32 : i32
    %2 = vector.broadcast %c32_i32 : i32 to vector<16x128xi32>
    %3 = arith.cmpi slt, %1, %2 : vector<16x128xi32>
    %4 = tpu.iota {dimensions = array<i32: 0>} : vector<64x32xi32>
    %c4_i32 = arith.constant 4 : i32
    %5 = vector.broadcast %c4_i32 : i32 to vector<64x32xi32>
    %6 = arith.shrsi %4, %5 : vector<64x32xi32>
    %7 = tpu.iota {dimensions = array<i32: 1>} : vector<64x32xi32>
    %c3_i32 = arith.constant 3 : i32
    %8 = vector.broadcast %c3_i32 : i32 to vector<64x32xi32>
    %9 = arith.shrsi %7, %8 : vector<64x32xi32>
    %10 = arith.cmpi eq, %6, %9 : vector<64x32xi32>
    %11 = tpu.iota {dimensions = array<i32: 0>} : vector<64x16xi32>
    %12 = tpu.iota {dimensions = array<i32: 1>} : vector<64x16xi32>
    %c15_i32 = arith.constant 15 : i32
    %13 = vector.broadcast %c15_i32 : i32 to vector<64x16xi32>
    %14 = arith.andi %11, %13 : vector<64x16xi32>
    %c3_i32_1 = arith.constant 3 : i32
    %15 = vector.broadcast %c3_i32_1 : i32 to vector<64x16xi32>
    %16 = arith.shrsi %14, %15 : vector<64x16xi32>
    %c3_i32_2 = arith.constant 3 : i32
    %17 = vector.broadcast %c3_i32_2 : i32 to vector<64x16xi32>
    %18 = arith.shrsi %12, %17 : vector<64x16xi32>
    %19 = arith.cmpi eq, %16, %18 : vector<64x16xi32>
    %c7_i32 = arith.constant 7 : i32
    %20 = vector.broadcast %c7_i32 : i32 to vector<64x16xi32>
    %21 = arith.andi %12, %20 : vector<64x16xi32>
    %c7_i32_3 = arith.constant 7 : i32
    %22 = vector.broadcast %c7_i32_3 : i32 to vector<64x16xi32>
    %23 = arith.andi %11, %22 : vector<64x16xi32>
    %24 = arith.cmpi sle, %21, %23 : vector<64x16xi32>
    %c0_4 = arith.constant 0 : index
    %c0_5 = arith.constant 0 : index
    %25 = vector.load %arg1[%c0_4, %c0_5] : memref<16x1xi32, #tpu.memory_space<vmem>>, vector<16x1xi32>
    %26 = vector.broadcast %25 : vector<16x1xi32> to vector<16x128xi32>
    %27 = arith.cmpi eq, %1, %26 : vector<16x128xi32>
    %28 = arith.extui %27 : vector<16x128xi1> to vector<16x128xi32>
    %29 = arith.sitofp %28 : vector<16x128xi32> to vector<16x128xf32>
    %30 = arith.truncf %29 : vector<16x128xf32> to vector<16x128xbf16>
    %31 = vector.extract_strided_slice %0 {offsets = [24, 0], sizes = [8, 128], strides = [1, 1]} : vector<40x128xf32> to vector<8x128xf32>
    %32 = tpu.concatenate %31, %31 in 0 : vector<8x128xf32>, vector<8x128xf32> -> vector<16x128xf32>
    %33 = vector.extract_strided_slice %0 {offsets = [32, 0], sizes = [8, 128], strides = [1, 1]} : vector<40x128xf32> to vector<8x128xf32>
    %34 = tpu.concatenate %33, %33 in 0 : vector<8x128xf32>, vector<8x128xf32> -> vector<16x128xf32>
    %c0_6 = arith.constant 0 : index
    %c0_7 = arith.constant 0 : index
    %c0_8 = arith.constant 0 : index
    %35 = vector.load %arg2[%c0_6, %c0_7, %c0_8] : memref<14x128x128xbf16, #tpu.memory_space<vmem>>, vector<1x128x128xbf16>
    %36 = vector.shape_cast %35 : vector<1x128x128xbf16> to vector<128x128xbf16>
    %cst = arith.constant dense<0.000000e+00> : vector<16x128xf32>
    %37 = tpu.matmul %30, %36, %cst {dimension_numbers = #tpu.dot_dimension_numbers<[1], [0], [0], [1], [0, 0, 1, 1], [], []>} : vector<16x128xbf16>, vector<128x128xbf16>, vector<16x128xf32> -> vector<16x128xf32>
    %38 = arith.addf %37, %32 : vector<16x128xf32>
    %c1 = arith.constant 1 : index
    %c0_9 = arith.constant 0 : index
    %c0_10 = arith.constant 0 : index
    %39 = vector.load %arg2[%c1, %c0_9, %c0_10] : memref<14x128x128xbf16, #tpu.memory_space<vmem>>, vector<1x128x128xbf16>
    %40 = vector.shape_cast %39 : vector<1x128x128xbf16> to vector<128x128xbf16>
    %cst_11 = arith.constant dense<0.000000e+00> : vector<16x128xf32>
    %41 = tpu.matmul %30, %40, %cst_11 {dimension_numbers = #tpu.dot_dimension_numbers<[1], [0], [0], [1], [0, 0, 1, 1], [], []>} : vector<16x128xbf16>, vector<128x128xbf16>, vector<16x128xf32> -> vector<16x128xf32>
    %42 = arith.addf %41, %34 : vector<16x128xf32>
    %43 = arith.truncf %38 : vector<16x128xf32> to vector<16x128xbf16>
    %c2 = arith.constant 2 : index
    %c0_12 = arith.constant 0 : index
    %c0_13 = arith.constant 0 : index
    %44 = vector.load %arg2[%c2, %c0_12, %c0_13] : memref<14x128x128xbf16, #tpu.memory_space<vmem>>, vector<1x128x128xbf16>
    %45 = vector.shape_cast %44 : vector<1x128x128xbf16> to vector<128x128xbf16>
    %cst_14 = arith.constant dense<0.000000e+00> : vector<16x128xf32>
    %46 = tpu.matmul %43, %45, %cst_14 {dimension_numbers = #tpu.dot_dimension_numbers<[1], [0], [0], [1], [0, 0, 1, 1], [], []>} : vector<16x128xbf16>, vector<128x128xbf16>, vector<16x128xf32> -> vector<16x128xf32>
    %47 = vector.extract_strided_slice %0 {offsets = [0, 0], sizes = [1, 128], strides = [1, 1]} : vector<40x128xf32> to vector<1x128xf32>
    %48 = vector.broadcast %47 : vector<1x128xf32> to vector<16x128xf32>
    %49 = arith.addf %46, %48 : vector<16x128xf32>
    %50 = vector.extract_strided_slice %49 {offsets = [0, 0], sizes = [16, 32], strides = [1, 1]} : vector<16x128xf32> to vector<16x32xf32>
    %51 = vector.extract_strided_slice %49 {offsets = [0, 32], sizes = [16, 32], strides = [1, 1]} : vector<16x128xf32> to vector<16x32xf32>
    %52 = vector.extract_strided_slice %49 {offsets = [0, 64], sizes = [16, 32], strides = [1, 1]} : vector<16x128xf32> to vector<16x32xf32>
    %53 = tpu.concatenate %50, %50, %50, %50 in 0 : vector<16x32xf32>, vector<16x32xf32>, vector<16x32xf32>, vector<16x32xf32> -> vector<64x32xf32>
    %cst_15 = arith.constant 0.000000e+00 : f32
    %54 = vector.broadcast %cst_15 : f32 to vector<64x32xf32>
    %55 = arith.select %10, %53, %54 : vector<64x32xi1>, vector<64x32xf32>
    %56 = arith.truncf %55 : vector<64x32xf32> to vector<64x32xbf16>
    %57 = arith.truncf %51 : vector<16x32xf32> to vector<16x32xbf16>
    %cst_16 = arith.constant dense<0.000000e+00> : vector<64x16xf32>
    %58 = tpu.matmul %56, %57, %cst_16 {dimension_numbers = #tpu.dot_dimension_numbers<[1], [1], [0], [0], [0, 0, 1, 0], [], []>} : vector<64x32xbf16>, vector<16x32xbf16>, vector<64x16xf32> -> vector<64x16xf32>
    %cst_17 = arith.constant 0.353553385 : f32
    %59 = vector.broadcast %cst_17 : f32 to vector<64x16xf32>
    %60 = arith.mulf %58, %59 : vector<64x16xf32>
    %cst_18 = arith.constant -1.000000e+30 : f32
    %61 = vector.broadcast %cst_18 : f32 to vector<64x16xf32>
    %62 = arith.select %19, %60, %61 : vector<64x16xi1>, vector<64x16xf32>
    %cst_19 = arith.constant dense<0xFF800000> : vector<64xf32>
    %63 = vector.multi_reduction <maximumf>, %62, %cst_19 [1] : vector<64x16xf32> to vector<64xf32>
    %64 = vector.shape_cast %63 : vector<64xf32> to vector<64x1xf32>
    %65 = vector.broadcast %64 : vector<64x1xf32> to vector<64x16xf32>
    %66 = arith.subf %62, %65 : vector<64x16xf32>
    %67 = math.exp %66 : vector<64x16xf32>
    %cst_20 = arith.constant dense<0.000000e+00> : vector<64xf32>
    %68 = vector.multi_reduction <add>, %67, %cst_20 [1] : vector<64x16xf32> to vector<64xf32>
    %69 = vector.shape_cast %68 : vector<64xf32> to vector<64x1xf32>
    %70 = tpu.reciprocal %69 {approx = true} : vector<64x1xf32> -> vector<64x1xf32>
    %71 = vector.broadcast %70 : vector<64x1xf32> to vector<64x16xf32>
    %72 = arith.mulf %67, %71 : vector<64x16xf32>
    %73 = arith.truncf %72 : vector<64x16xf32> to vector<64x16xbf16>
    %74 = arith.truncf %52 : vector<16x32xf32> to vector<16x32xbf16>
    %cst_21 = arith.constant dense<0.000000e+00> : vector<64x32xf32>
    %75 = tpu.matmul %73, %74, %cst_21 {dimension_numbers = #tpu.dot_dimension_numbers<[1], [0], [0], [1], [0, 0, 1, 1], [], []>} : vector<64x16xbf16>, vector<16x32xbf16>, vector<64x32xf32> -> vector<64x32xf32>
    %cst_22 = arith.constant 0.000000e+00 : f32
    %76 = vector.broadcast %cst_22 : f32 to vector<64x32xf32>
    %77 = arith.select %10, %75, %76 : vector<64x32xi1>, vector<64x32xf32>
    %78 = vector.extract_strided_slice %77 {offsets = [0, 0], sizes = [16, 32], strides = [1, 1]} : vector<64x32xf32> to vector<16x32xf32>
    %79 = vector.extract_strided_slice %77 {offsets = [16, 0], sizes = [16, 32], strides = [1, 1]} : vector<64x32xf32> to vector<16x32xf32>
    %80 = arith.addf %78, %79 : vector<16x32xf32>
    %81 = vector.extract_strided_slice %77 {offsets = [32, 0], sizes = [16, 32], strides = [1, 1]} : vector<64x32xf32> to vector<16x32xf32>
    %82 = arith.addf %80, %81 : vector<16x32xf32>
    %83 = vector.extract_strided_slice %77 {offsets = [48, 0], sizes = [16, 32], strides = [1, 1]} : vector<64x32xf32> to vector<16x32xf32>
    %84 = arith.addf %82, %83 : vector<16x32xf32>
    %85 = arith.truncf %84 : vector<16x32xf32> to vector<16x32xbf16>
    %c3 = arith.constant 3 : index
    %c0_23 = arith.constant 0 : index
    %c0_24 = arith.constant 0 : index
    %86 = vector.load %arg2[%c3, %c0_23, %c0_24] : memref<14x128x128xbf16, #tpu.memory_space<vmem>>, vector<1x32x128xbf16>
    %87 = vector.shape_cast %86 : vector<1x32x128xbf16> to vector<32x128xbf16>
    %cst_25 = arith.constant dense<0.000000e+00> : vector<16x128xf32>
    %88 = tpu.matmul %85, %87, %cst_25 {dimension_numbers = #tpu.dot_dimension_numbers<[1], [0], [0], [1], [0, 0, 1, 1], [], []>} : vector<16x32xbf16>, vector<32x128xbf16>, vector<16x128xf32> -> vector<16x128xf32>
    %89 = vector.extract_strided_slice %0 {offsets = [1, 0], sizes = [1, 128], strides = [1, 1]} : vector<40x128xf32> to vector<1x128xf32>
    %90 = vector.broadcast %89 : vector<1x128xf32> to vector<16x128xf32>
    %91 = arith.addf %88, %90 : vector<16x128xf32>
    %92 = arith.addf %38, %91 : vector<16x128xf32>
    %cst_26 = arith.constant dense<0.000000e+00> : vector<16xf32>
    %93 = vector.multi_reduction <add>, %92, %cst_26 [1] : vector<16x128xf32> to vector<16xf32>
    %94 = vector.shape_cast %93 : vector<16xf32> to vector<16x1xf32>
    %cst_27 = arith.constant 3.125000e-02 : f32
    %95 = vector.broadcast %cst_27 : f32 to vector<16x1xf32>
    %96 = arith.mulf %94, %95 : vector<16x1xf32>
    %97 = vector.broadcast %96 : vector<16x1xf32> to vector<16x128xf32>
    %98 = arith.subf %92, %97 : vector<16x128xf32>
    %cst_28 = arith.constant 0.000000e+00 : f32
    %99 = vector.broadcast %cst_28 : f32 to vector<16x128xf32>
    %100 = arith.select %3, %98, %99 : vector<16x128xi1>, vector<16x128xf32>
    %101 = arith.mulf %100, %100 : vector<16x128xf32>
    %cst_29 = arith.constant dense<0.000000e+00> : vector<16xf32>
    %102 = vector.multi_reduction <add>, %101, %cst_29 [1] : vector<16x128xf32> to vector<16xf32>
    %103 = vector.shape_cast %102 : vector<16xf32> to vector<16x1xf32>
    %cst_30 = arith.constant 3.125000e-02 : f32
    %104 = vector.broadcast %cst_30 : f32 to vector<16x1xf32>
    %105 = arith.mulf %103, %104 : vector<16x1xf32>
    %cst_31 = arith.constant 9.99999974E-6 : f32
    %106 = vector.broadcast %cst_31 : f32 to vector<16x1xf32>
    %107 = arith.addf %105, %106 : vector<16x1xf32>
    %108 = math.rsqrt %107 : vector<16x1xf32>
    %109 = vector.broadcast %108 : vector<16x1xf32> to vector<16x128xf32>
    %110 = arith.mulf %100, %109 : vector<16x128xf32>
    %111 = vector.extract_strided_slice %0 {offsets = [2, 0], sizes = [1, 128], strides = [1, 1]} : vector<40x128xf32> to vector<1x128xf32>
    %112 = vector.broadcast %111 : vector<1x128xf32> to vector<16x128xf32>
    %113 = arith.mulf %110, %112 : vector<16x128xf32>
    %114 = vector.extract_strided_slice %0 {offsets = [3, 0], sizes = [1, 128], strides = [1, 1]} : vector<40x128xf32> to vector<1x128xf32>
    %115 = vector.broadcast %114 : vector<1x128xf32> to vector<16x128xf32>
    %116 = arith.addf %113, %115 : vector<16x128xf32>
    %117 = arith.truncf %116 : vector<16x128xf32> to vector<16x128xbf16>
    %c4 = arith.constant 4 : index
    %c0_32 = arith.constant 0 : index
    %c0_33 = arith.constant 0 : index
    %118 = vector.load %arg2[%c4, %c0_32, %c0_33] : memref<14x128x128xbf16, #tpu.memory_space<vmem>>, vector<1x128x128xbf16>
    %119 = vector.shape_cast %118 : vector<1x128x128xbf16> to vector<128x128xbf16>
    %cst_34 = arith.constant dense<0.000000e+00> : vector<16x128xf32>
    %120 = tpu.matmul %117, %119, %cst_34 {dimension_numbers = #tpu.dot_dimension_numbers<[1], [0], [0], [1], [0, 0, 1, 1], [], []>} : vector<16x128xbf16>, vector<128x128xbf16>, vector<16x128xf32> -> vector<16x128xf32>
    %121 = vector.extract_strided_slice %0 {offsets = [4, 0], sizes = [1, 128], strides = [1, 1]} : vector<40x128xf32> to vector<1x128xf32>
    %122 = vector.broadcast %121 : vector<1x128xf32> to vector<16x128xf32>
    %123 = arith.addf %120, %122 : vector<16x128xf32>
    %cst_35 = arith.constant 0.000000e+00 : f32
    %124 = vector.broadcast %cst_35 : f32 to vector<16x128xf32>
    %125 = arith.maximumf %123, %124 : vector<16x128xf32>
    %126 = arith.truncf %125 : vector<16x128xf32> to vector<16x128xbf16>
    %c5 = arith.constant 5 : index
    %c0_36 = arith.constant 0 : index
    %c0_37 = arith.constant 0 : index
    %127 = vector.load %arg2[%c5, %c0_36, %c0_37] : memref<14x128x128xbf16, #tpu.memory_space<vmem>>, vector<1x128x128xbf16>
    %128 = vector.shape_cast %127 : vector<1x128x128xbf16> to vector<128x128xbf16>
    %cst_38 = arith.constant dense<0.000000e+00> : vector<16x128xf32>
    %129 = tpu.matmul %126, %128, %cst_38 {dimension_numbers = #tpu.dot_dimension_numbers<[1], [0], [0], [1], [0, 0, 1, 1], [], []>} : vector<16x128xbf16>, vector<128x128xbf16>, vector<16x128xf32> -> vector<16x128xf32>
    %130 = vector.extract_strided_slice %0 {offsets = [5, 0], sizes = [1, 128], strides = [1, 1]} : vector<40x128xf32> to vector<1x128xf32>
    %131 = vector.broadcast %130 : vector<1x128xf32> to vector<16x128xf32>
    %132 = arith.addf %129, %131 : vector<16x128xf32>
    %133 = arith.addf %116, %132 : vector<16x128xf32>
    %cst_39 = arith.constant dense<0.000000e+00> : vector<16xf32>
    %134 = vector.multi_reduction <add>, %133, %cst_39 [1] : vector<16x128xf32> to vector<16xf32>
    %135 = vector.shape_cast %134 : vector<16xf32> to vector<16x1xf32>
    %cst_40 = arith.constant 3.125000e-02 : f32
    %136 = vector.broadcast %cst_40 : f32 to vector<16x1xf32>
    %137 = arith.mulf %135, %136 : vector<16x1xf32>
    %138 = vector.broadcast %137 : vector<16x1xf32> to vector<16x128xf32>
    %139 = arith.subf %133, %138 : vector<16x128xf32>
    %cst_41 = arith.constant 0.000000e+00 : f32
    %140 = vector.broadcast %cst_41 : f32 to vector<16x128xf32>
    %141 = arith.select %3, %139, %140 : vector<16x128xi1>, vector<16x128xf32>
    %142 = arith.mulf %141, %141 : vector<16x128xf32>
    %cst_42 = arith.constant dense<0.000000e+00> : vector<16xf32>
    %143 = vector.multi_reduction <add>, %142, %cst_42 [1] : vector<16x128xf32> to vector<16xf32>
    %144 = vector.shape_cast %143 : vector<16xf32> to vector<16x1xf32>
    %cst_43 = arith.constant 3.125000e-02 : f32
    %145 = vector.broadcast %cst_43 : f32 to vector<16x1xf32>
    %146 = arith.mulf %144, %145 : vector<16x1xf32>
    %cst_44 = arith.constant 9.99999974E-6 : f32
    %147 = vector.broadcast %cst_44 : f32 to vector<16x1xf32>
    %148 = arith.addf %146, %147 : vector<16x1xf32>
    %149 = math.rsqrt %148 : vector<16x1xf32>
    %150 = vector.broadcast %149 : vector<16x1xf32> to vector<16x128xf32>
    %151 = arith.mulf %141, %150 : vector<16x128xf32>
    %152 = vector.extract_strided_slice %0 {offsets = [6, 0], sizes = [1, 128], strides = [1, 1]} : vector<40x128xf32> to vector<1x128xf32>
    %153 = vector.broadcast %152 : vector<1x128xf32> to vector<16x128xf32>
    %154 = arith.mulf %151, %153 : vector<16x128xf32>
    %155 = vector.extract_strided_slice %0 {offsets = [7, 0], sizes = [1, 128], strides = [1, 1]} : vector<40x128xf32> to vector<1x128xf32>
    %156 = vector.broadcast %155 : vector<1x128xf32> to vector<16x128xf32>
    %157 = arith.addf %154, %156 : vector<16x128xf32>
    %158 = arith.truncf %42 : vector<16x128xf32> to vector<16x128xbf16>
    %c6 = arith.constant 6 : index
    %c0_45 = arith.constant 0 : index
    %c0_46 = arith.constant 0 : index
    %159 = vector.load %arg2[%c6, %c0_45, %c0_46] : memref<14x128x128xbf16, #tpu.memory_space<vmem>>, vector<1x128x128xbf16>
    %160 = vector.shape_cast %159 : vector<1x128x128xbf16> to vector<128x128xbf16>
    %cst_47 = arith.constant dense<0.000000e+00> : vector<16x128xf32>
    %161 = tpu.matmul %158, %160, %cst_47 {dimension_numbers = #tpu.dot_dimension_numbers<[1], [0], [0], [1], [0, 0, 1, 1], [], []>} : vector<16x128xbf16>, vector<128x128xbf16>, vector<16x128xf32> -> vector<16x128xf32>
    %162 = vector.extract_strided_slice %0 {offsets = [8, 0], sizes = [1, 128], strides = [1, 1]} : vector<40x128xf32> to vector<1x128xf32>
    %163 = vector.broadcast %162 : vector<1x128xf32> to vector<16x128xf32>
    %164 = arith.addf %161, %163 : vector<16x128xf32>
    %165 = vector.extract_strided_slice %164 {offsets = [0, 0], sizes = [16, 32], strides = [1, 1]} : vector<16x128xf32> to vector<16x32xf32>
    %166 = vector.extract_strided_slice %164 {offsets = [0, 32], sizes = [16, 32], strides = [1, 1]} : vector<16x128xf32> to vector<16x32xf32>
    %167 = vector.extract_strided_slice %164 {offsets = [0, 64], sizes = [16, 32], strides = [1, 1]} : vector<16x128xf32> to vector<16x32xf32>
    %168 = tpu.concatenate %165, %165, %165, %165 in 0 : vector<16x32xf32>, vector<16x32xf32>, vector<16x32xf32>, vector<16x32xf32> -> vector<64x32xf32>
    %cst_48 = arith.constant 0.000000e+00 : f32
    %169 = vector.broadcast %cst_48 : f32 to vector<64x32xf32>
    %170 = arith.select %10, %168, %169 : vector<64x32xi1>, vector<64x32xf32>
    %171 = arith.truncf %170 : vector<64x32xf32> to vector<64x32xbf16>
    %172 = arith.truncf %166 : vector<16x32xf32> to vector<16x32xbf16>
    %cst_49 = arith.constant dense<0.000000e+00> : vector<64x16xf32>
    %173 = tpu.matmul %171, %172, %cst_49 {dimension_numbers = #tpu.dot_dimension_numbers<[1], [1], [0], [0], [0, 0, 1, 0], [], []>} : vector<64x32xbf16>, vector<16x32xbf16>, vector<64x16xf32> -> vector<64x16xf32>
    %cst_50 = arith.constant 0.353553385 : f32
    %174 = vector.broadcast %cst_50 : f32 to vector<64x16xf32>
    %175 = arith.mulf %173, %174 : vector<64x16xf32>
    %176 = arith.andi %19, %24 : vector<64x16xi1>
    %cst_51 = arith.constant -1.000000e+30 : f32
    %177 = vector.broadcast %cst_51 : f32 to vector<64x16xf32>
    %178 = arith.select %176, %175, %177 : vector<64x16xi1>, vector<64x16xf32>
    %cst_52 = arith.constant dense<0xFF800000> : vector<64xf32>
    %179 = vector.multi_reduction <maximumf>, %178, %cst_52 [1] : vector<64x16xf32> to vector<64xf32>
    %180 = vector.shape_cast %179 : vector<64xf32> to vector<64x1xf32>
    %181 = vector.broadcast %180 : vector<64x1xf32> to vector<64x16xf32>
    %182 = arith.subf %178, %181 : vector<64x16xf32>
    %183 = math.exp %182 : vector<64x16xf32>
    %cst_53 = arith.constant dense<0.000000e+00> : vector<64xf32>
    %184 = vector.multi_reduction <add>, %183, %cst_53 [1] : vector<64x16xf32> to vector<64xf32>
    %185 = vector.shape_cast %184 : vector<64xf32> to vector<64x1xf32>
    %186 = tpu.reciprocal %185 {approx = true} : vector<64x1xf32> -> vector<64x1xf32>
    %187 = vector.broadcast %186 : vector<64x1xf32> to vector<64x16xf32>
    %188 = arith.mulf %183, %187 : vector<64x16xf32>
    %189 = arith.truncf %188 : vector<64x16xf32> to vector<64x16xbf16>
    %190 = arith.truncf %167 : vector<16x32xf32> to vector<16x32xbf16>
    %cst_54 = arith.constant dense<0.000000e+00> : vector<64x32xf32>
    %191 = tpu.matmul %189, %190, %cst_54 {dimension_numbers = #tpu.dot_dimension_numbers<[1], [0], [0], [1], [0, 0, 1, 1], [], []>} : vector<64x16xbf16>, vector<16x32xbf16>, vector<64x32xf32> -> vector<64x32xf32>
    %cst_55 = arith.constant 0.000000e+00 : f32
    %192 = vector.broadcast %cst_55 : f32 to vector<64x32xf32>
    %193 = arith.select %10, %191, %192 : vector<64x32xi1>, vector<64x32xf32>
    %194 = vector.extract_strided_slice %193 {offsets = [0, 0], sizes = [16, 32], strides = [1, 1]} : vector<64x32xf32> to vector<16x32xf32>
    %195 = vector.extract_strided_slice %193 {offsets = [16, 0], sizes = [16, 32], strides = [1, 1]} : vector<64x32xf32> to vector<16x32xf32>
    %196 = arith.addf %194, %195 : vector<16x32xf32>
    %197 = vector.extract_strided_slice %193 {offsets = [32, 0], sizes = [16, 32], strides = [1, 1]} : vector<64x32xf32> to vector<16x32xf32>
    %198 = arith.addf %196, %197 : vector<16x32xf32>
    %199 = vector.extract_strided_slice %193 {offsets = [48, 0], sizes = [16, 32], strides = [1, 1]} : vector<64x32xf32> to vector<16x32xf32>
    %200 = arith.addf %198, %199 : vector<16x32xf32>
    %201 = arith.truncf %200 : vector<16x32xf32> to vector<16x32xbf16>
    %c7 = arith.constant 7 : index
    %c0_56 = arith.constant 0 : index
    %c0_57 = arith.constant 0 : index
    %202 = vector.load %arg2[%c7, %c0_56, %c0_57] : memref<14x128x128xbf16, #tpu.memory_space<vmem>>, vector<1x32x128xbf16>
    %203 = vector.shape_cast %202 : vector<1x32x128xbf16> to vector<32x128xbf16>
    %cst_58 = arith.constant dense<0.000000e+00> : vector<16x128xf32>
    %204 = tpu.matmul %201, %203, %cst_58 {dimension_numbers = #tpu.dot_dimension_numbers<[1], [0], [0], [1], [0, 0, 1, 1], [], []>} : vector<16x32xbf16>, vector<32x128xbf16>, vector<16x128xf32> -> vector<16x128xf32>
    %205 = vector.extract_strided_slice %0 {offsets = [9, 0], sizes = [1, 128], strides = [1, 1]} : vector<40x128xf32> to vector<1x128xf32>
    %206 = vector.broadcast %205 : vector<1x128xf32> to vector<16x128xf32>
    %207 = arith.addf %204, %206 : vector<16x128xf32>
    %208 = arith.addf %42, %207 : vector<16x128xf32>
    %cst_59 = arith.constant dense<0.000000e+00> : vector<16xf32>
    %209 = vector.multi_reduction <add>, %208, %cst_59 [1] : vector<16x128xf32> to vector<16xf32>
    %210 = vector.shape_cast %209 : vector<16xf32> to vector<16x1xf32>
    %cst_60 = arith.constant 3.125000e-02 : f32
    %211 = vector.broadcast %cst_60 : f32 to vector<16x1xf32>
    %212 = arith.mulf %210, %211 : vector<16x1xf32>
    %213 = vector.broadcast %212 : vector<16x1xf32> to vector<16x128xf32>
    %214 = arith.subf %208, %213 : vector<16x128xf32>
    %cst_61 = arith.constant 0.000000e+00 : f32
    %215 = vector.broadcast %cst_61 : f32 to vector<16x128xf32>
    %216 = arith.select %3, %214, %215 : vector<16x128xi1>, vector<16x128xf32>
    %217 = arith.mulf %216, %216 : vector<16x128xf32>
    %cst_62 = arith.constant dense<0.000000e+00> : vector<16xf32>
    %218 = vector.multi_reduction <add>, %217, %cst_62 [1] : vector<16x128xf32> to vector<16xf32>
    %219 = vector.shape_cast %218 : vector<16xf32> to vector<16x1xf32>
    %cst_63 = arith.constant 3.125000e-02 : f32
    %220 = vector.broadcast %cst_63 : f32 to vector<16x1xf32>
    %221 = arith.mulf %219, %220 : vector<16x1xf32>
    %cst_64 = arith.constant 9.99999974E-6 : f32
    %222 = vector.broadcast %cst_64 : f32 to vector<16x1xf32>
    %223 = arith.addf %221, %222 : vector<16x1xf32>
    %224 = math.rsqrt %223 : vector<16x1xf32>
    %225 = vector.broadcast %224 : vector<16x1xf32> to vector<16x128xf32>
    %226 = arith.mulf %216, %225 : vector<16x128xf32>
    %227 = vector.extract_strided_slice %0 {offsets = [10, 0], sizes = [1, 128], strides = [1, 1]} : vector<40x128xf32> to vector<1x128xf32>
    %228 = vector.broadcast %227 : vector<1x128xf32> to vector<16x128xf32>
    %229 = arith.mulf %226, %228 : vector<16x128xf32>
    %230 = vector.extract_strided_slice %0 {offsets = [11, 0], sizes = [1, 128], strides = [1, 1]} : vector<40x128xf32> to vector<1x128xf32>
    %231 = vector.broadcast %230 : vector<1x128xf32> to vector<16x128xf32>
    %232 = arith.addf %229, %231 : vector<16x128xf32>
    %233 = arith.truncf %232 : vector<16x128xf32> to vector<16x128xbf16>
    %c8 = arith.constant 8 : index
    %c0_65 = arith.constant 0 : index
    %c0_66 = arith.constant 0 : index
    %234 = vector.load %arg2[%c8, %c0_65, %c0_66] : memref<14x128x128xbf16, #tpu.memory_space<vmem>>, vector<1x128x128xbf16>
    %235 = vector.shape_cast %234 : vector<1x128x128xbf16> to vector<128x128xbf16>
    %cst_67 = arith.constant dense<0.000000e+00> : vector<16x128xf32>
    %236 = tpu.matmul %233, %235, %cst_67 {dimension_numbers = #tpu.dot_dimension_numbers<[1], [0], [0], [1], [0, 0, 1, 1], [], []>} : vector<16x128xbf16>, vector<128x128xbf16>, vector<16x128xf32> -> vector<16x128xf32>
    %237 = vector.extract_strided_slice %0 {offsets = [12, 0], sizes = [1, 128], strides = [1, 1]} : vector<40x128xf32> to vector<1x128xf32>
    %238 = vector.broadcast %237 : vector<1x128xf32> to vector<16x128xf32>
    %239 = arith.addf %236, %238 : vector<16x128xf32>
    %240 = vector.extract_strided_slice %239 {offsets = [0, 0], sizes = [16, 32], strides = [1, 1]} : vector<16x128xf32> to vector<16x32xf32>
    %241 = arith.truncf %157 : vector<16x128xf32> to vector<16x128xbf16>
    %c9 = arith.constant 9 : index
    %c0_68 = arith.constant 0 : index
    %c0_69 = arith.constant 0 : index
    %242 = vector.load %arg2[%c9, %c0_68, %c0_69] : memref<14x128x128xbf16, #tpu.memory_space<vmem>>, vector<1x128x128xbf16>
    %243 = vector.shape_cast %242 : vector<1x128x128xbf16> to vector<128x128xbf16>
    %cst_70 = arith.constant dense<0.000000e+00> : vector<16x128xf32>
    %244 = tpu.matmul %241, %243, %cst_70 {dimension_numbers = #tpu.dot_dimension_numbers<[1], [0], [0], [1], [0, 0, 1, 1], [], []>} : vector<16x128xbf16>, vector<128x128xbf16>, vector<16x128xf32> -> vector<16x128xf32>
    %245 = vector.extract_strided_slice %0 {offsets = [13, 0], sizes = [1, 128], strides = [1, 1]} : vector<40x128xf32> to vector<1x128xf32>
    %246 = vector.broadcast %245 : vector<1x128xf32> to vector<16x128xf32>
    %247 = arith.addf %244, %246 : vector<16x128xf32>
    %248 = vector.extract_strided_slice %247 {offsets = [0, 0], sizes = [16, 32], strides = [1, 1]} : vector<16x128xf32> to vector<16x32xf32>
    %249 = vector.extract_strided_slice %247 {offsets = [0, 32], sizes = [16, 32], strides = [1, 1]} : vector<16x128xf32> to vector<16x32xf32>
    %250 = tpu.concatenate %240, %240, %240, %240 in 0 : vector<16x32xf32>, vector<16x32xf32>, vector<16x32xf32>, vector<16x32xf32> -> vector<64x32xf32>
    %cst_71 = arith.constant 0.000000e+00 : f32
    %251 = vector.broadcast %cst_71 : f32 to vector<64x32xf32>
    %252 = arith.select %10, %250, %251 : vector<64x32xi1>, vector<64x32xf32>
    %253 = arith.truncf %252 : vector<64x32xf32> to vector<64x32xbf16>
    %254 = arith.truncf %248 : vector<16x32xf32> to vector<16x32xbf16>
    %cst_72 = arith.constant dense<0.000000e+00> : vector<64x16xf32>
    %255 = tpu.matmul %253, %254, %cst_72 {dimension_numbers = #tpu.dot_dimension_numbers<[1], [1], [0], [0], [0, 0, 1, 0], [], []>} : vector<64x32xbf16>, vector<16x32xbf16>, vector<64x16xf32> -> vector<64x16xf32>
    %cst_73 = arith.constant 0.353553385 : f32
    %256 = vector.broadcast %cst_73 : f32 to vector<64x16xf32>
    %257 = arith.mulf %255, %256 : vector<64x16xf32>
    %cst_74 = arith.constant -1.000000e+30 : f32
    %258 = vector.broadcast %cst_74 : f32 to vector<64x16xf32>
    %259 = arith.select %19, %257, %258 : vector<64x16xi1>, vector<64x16xf32>
    %cst_75 = arith.constant dense<0xFF800000> : vector<64xf32>
    %260 = vector.multi_reduction <maximumf>, %259, %cst_75 [1] : vector<64x16xf32> to vector<64xf32>
    %261 = vector.shape_cast %260 : vector<64xf32> to vector<64x1xf32>
    %262 = vector.broadcast %261 : vector<64x1xf32> to vector<64x16xf32>
    %263 = arith.subf %259, %262 : vector<64x16xf32>
    %264 = math.exp %263 : vector<64x16xf32>
    %cst_76 = arith.constant dense<0.000000e+00> : vector<64xf32>
    %265 = vector.multi_reduction <add>, %264, %cst_76 [1] : vector<64x16xf32> to vector<64xf32>
    %266 = vector.shape_cast %265 : vector<64xf32> to vector<64x1xf32>
    %267 = tpu.reciprocal %266 {approx = true} : vector<64x1xf32> -> vector<64x1xf32>
    %268 = vector.broadcast %267 : vector<64x1xf32> to vector<64x16xf32>
    %269 = arith.mulf %264, %268 : vector<64x16xf32>
    %270 = arith.truncf %269 : vector<64x16xf32> to vector<64x16xbf16>
    %271 = arith.truncf %249 : vector<16x32xf32> to vector<16x32xbf16>
    %cst_77 = arith.constant dense<0.000000e+00> : vector<64x32xf32>
    %272 = tpu.matmul %270, %271, %cst_77 {dimension_numbers = #tpu.dot_dimension_numbers<[1], [0], [0], [1], [0, 0, 1, 1], [], []>} : vector<64x16xbf16>, vector<16x32xbf16>, vector<64x32xf32> -> vector<64x32xf32>
    %cst_78 = arith.constant 0.000000e+00 : f32
    %273 = vector.broadcast %cst_78 : f32 to vector<64x32xf32>
    %274 = arith.select %10, %272, %273 : vector<64x32xi1>, vector<64x32xf32>
    %275 = vector.extract_strided_slice %274 {offsets = [0, 0], sizes = [16, 32], strides = [1, 1]} : vector<64x32xf32> to vector<16x32xf32>
    %276 = vector.extract_strided_slice %274 {offsets = [16, 0], sizes = [16, 32], strides = [1, 1]} : vector<64x32xf32> to vector<16x32xf32>
    %277 = arith.addf %275, %276 : vector<16x32xf32>
    %278 = vector.extract_strided_slice %274 {offsets = [32, 0], sizes = [16, 32], strides = [1, 1]} : vector<64x32xf32> to vector<16x32xf32>
    %279 = arith.addf %277, %278 : vector<16x32xf32>
    %280 = vector.extract_strided_slice %274 {offsets = [48, 0], sizes = [16, 32], strides = [1, 1]} : vector<64x32xf32> to vector<16x32xf32>
    %281 = arith.addf %279, %280 : vector<16x32xf32>
    %282 = arith.truncf %281 : vector<16x32xf32> to vector<16x32xbf16>
    %c10 = arith.constant 10 : index
    %c0_79 = arith.constant 0 : index
    %c0_80 = arith.constant 0 : index
    %283 = vector.load %arg2[%c10, %c0_79, %c0_80] : memref<14x128x128xbf16, #tpu.memory_space<vmem>>, vector<1x32x128xbf16>
    %284 = vector.shape_cast %283 : vector<1x32x128xbf16> to vector<32x128xbf16>
    %cst_81 = arith.constant dense<0.000000e+00> : vector<16x128xf32>
    %285 = tpu.matmul %282, %284, %cst_81 {dimension_numbers = #tpu.dot_dimension_numbers<[1], [0], [0], [1], [0, 0, 1, 1], [], []>} : vector<16x32xbf16>, vector<32x128xbf16>, vector<16x128xf32> -> vector<16x128xf32>
    %286 = vector.extract_strided_slice %0 {offsets = [14, 0], sizes = [1, 128], strides = [1, 1]} : vector<40x128xf32> to vector<1x128xf32>
    %287 = vector.broadcast %286 : vector<1x128xf32> to vector<16x128xf32>
    %288 = arith.addf %285, %287 : vector<16x128xf32>
    %289 = arith.addf %232, %288 : vector<16x128xf32>
    %cst_82 = arith.constant dense<0.000000e+00> : vector<16xf32>
    %290 = vector.multi_reduction <add>, %289, %cst_82 [1] : vector<16x128xf32> to vector<16xf32>
    %291 = vector.shape_cast %290 : vector<16xf32> to vector<16x1xf32>
    %cst_83 = arith.constant 3.125000e-02 : f32
    %292 = vector.broadcast %cst_83 : f32 to vector<16x1xf32>
    %293 = arith.mulf %291, %292 : vector<16x1xf32>
    %294 = vector.broadcast %293 : vector<16x1xf32> to vector<16x128xf32>
    %295 = arith.subf %289, %294 : vector<16x128xf32>
    %cst_84 = arith.constant 0.000000e+00 : f32
    %296 = vector.broadcast %cst_84 : f32 to vector<16x128xf32>
    %297 = arith.select %3, %295, %296 : vector<16x128xi1>, vector<16x128xf32>
    %298 = arith.mulf %297, %297 : vector<16x128xf32>
    %cst_85 = arith.constant dense<0.000000e+00> : vector<16xf32>
    %299 = vector.multi_reduction <add>, %298, %cst_85 [1] : vector<16x128xf32> to vector<16xf32>
    %300 = vector.shape_cast %299 : vector<16xf32> to vector<16x1xf32>
    %cst_86 = arith.constant 3.125000e-02 : f32
    %301 = vector.broadcast %cst_86 : f32 to vector<16x1xf32>
    %302 = arith.mulf %300, %301 : vector<16x1xf32>
    %cst_87 = arith.constant 9.99999974E-6 : f32
    %303 = vector.broadcast %cst_87 : f32 to vector<16x1xf32>
    %304 = arith.addf %302, %303 : vector<16x1xf32>
    %305 = math.rsqrt %304 : vector<16x1xf32>
    %306 = vector.broadcast %305 : vector<16x1xf32> to vector<16x128xf32>
    %307 = arith.mulf %297, %306 : vector<16x128xf32>
    %308 = vector.extract_strided_slice %0 {offsets = [15, 0], sizes = [1, 128], strides = [1, 1]} : vector<40x128xf32> to vector<1x128xf32>
    %309 = vector.broadcast %308 : vector<1x128xf32> to vector<16x128xf32>
    %310 = arith.mulf %307, %309 : vector<16x128xf32>
    %311 = vector.extract_strided_slice %0 {offsets = [16, 0], sizes = [1, 128], strides = [1, 1]} : vector<40x128xf32> to vector<1x128xf32>
    %312 = vector.broadcast %311 : vector<1x128xf32> to vector<16x128xf32>
    %313 = arith.addf %310, %312 : vector<16x128xf32>
    %314 = arith.truncf %313 : vector<16x128xf32> to vector<16x128xbf16>
    %c11 = arith.constant 11 : index
    %c0_88 = arith.constant 0 : index
    %c0_89 = arith.constant 0 : index
    %315 = vector.load %arg2[%c11, %c0_88, %c0_89] : memref<14x128x128xbf16, #tpu.memory_space<vmem>>, vector<1x128x128xbf16>
    %316 = vector.shape_cast %315 : vector<1x128x128xbf16> to vector<128x128xbf16>
    %cst_90 = arith.constant dense<0.000000e+00> : vector<16x128xf32>
    %317 = tpu.matmul %314, %316, %cst_90 {dimension_numbers = #tpu.dot_dimension_numbers<[1], [0], [0], [1], [0, 0, 1, 1], [], []>} : vector<16x128xbf16>, vector<128x128xbf16>, vector<16x128xf32> -> vector<16x128xf32>
    %318 = vector.extract_strided_slice %0 {offsets = [17, 0], sizes = [1, 128], strides = [1, 1]} : vector<40x128xf32> to vector<1x128xf32>
    %319 = vector.broadcast %318 : vector<1x128xf32> to vector<16x128xf32>
    %320 = arith.addf %317, %319 : vector<16x128xf32>
    %cst_91 = arith.constant 0.000000e+00 : f32
    %321 = vector.broadcast %cst_91 : f32 to vector<16x128xf32>
    %322 = arith.maximumf %320, %321 : vector<16x128xf32>
    %323 = arith.truncf %322 : vector<16x128xf32> to vector<16x128xbf16>
    %c12 = arith.constant 12 : index
    %c0_92 = arith.constant 0 : index
    %c0_93 = arith.constant 0 : index
    %324 = vector.load %arg2[%c12, %c0_92, %c0_93] : memref<14x128x128xbf16, #tpu.memory_space<vmem>>, vector<1x128x128xbf16>
    %325 = vector.shape_cast %324 : vector<1x128x128xbf16> to vector<128x128xbf16>
    %cst_94 = arith.constant dense<0.000000e+00> : vector<16x128xf32>
    %326 = tpu.matmul %323, %325, %cst_94 {dimension_numbers = #tpu.dot_dimension_numbers<[1], [0], [0], [1], [0, 0, 1, 1], [], []>} : vector<16x128xbf16>, vector<128x128xbf16>, vector<16x128xf32> -> vector<16x128xf32>
    %327 = vector.extract_strided_slice %0 {offsets = [18, 0], sizes = [1, 128], strides = [1, 1]} : vector<40x128xf32> to vector<1x128xf32>
    %328 = vector.broadcast %327 : vector<1x128xf32> to vector<16x128xf32>
    %329 = arith.addf %326, %328 : vector<16x128xf32>
    %330 = arith.addf %313, %329 : vector<16x128xf32>
    %cst_95 = arith.constant dense<0.000000e+00> : vector<16xf32>
    %331 = vector.multi_reduction <add>, %330, %cst_95 [1] : vector<16x128xf32> to vector<16xf32>
    %332 = vector.shape_cast %331 : vector<16xf32> to vector<16x1xf32>
    %cst_96 = arith.constant 3.125000e-02 : f32
    %333 = vector.broadcast %cst_96 : f32 to vector<16x1xf32>
    %334 = arith.mulf %332, %333 : vector<16x1xf32>
    %335 = vector.broadcast %334 : vector<16x1xf32> to vector<16x128xf32>
    %336 = arith.subf %330, %335 : vector<16x128xf32>
    %cst_97 = arith.constant 0.000000e+00 : f32
    %337 = vector.broadcast %cst_97 : f32 to vector<16x128xf32>
    %338 = arith.select %3, %336, %337 : vector<16x128xi1>, vector<16x128xf32>
    %339 = arith.mulf %338, %338 : vector<16x128xf32>
    %cst_98 = arith.constant dense<0.000000e+00> : vector<16xf32>
    %340 = vector.multi_reduction <add>, %339, %cst_98 [1] : vector<16x128xf32> to vector<16xf32>
    %341 = vector.shape_cast %340 : vector<16xf32> to vector<16x1xf32>
    %cst_99 = arith.constant 3.125000e-02 : f32
    %342 = vector.broadcast %cst_99 : f32 to vector<16x1xf32>
    %343 = arith.mulf %341, %342 : vector<16x1xf32>
    %cst_100 = arith.constant 9.99999974E-6 : f32
    %344 = vector.broadcast %cst_100 : f32 to vector<16x1xf32>
    %345 = arith.addf %343, %344 : vector<16x1xf32>
    %346 = math.rsqrt %345 : vector<16x1xf32>
    %347 = vector.broadcast %346 : vector<16x1xf32> to vector<16x128xf32>
    %348 = arith.mulf %338, %347 : vector<16x128xf32>
    %349 = vector.extract_strided_slice %0 {offsets = [19, 0], sizes = [1, 128], strides = [1, 1]} : vector<40x128xf32> to vector<1x128xf32>
    %350 = vector.broadcast %349 : vector<1x128xf32> to vector<16x128xf32>
    %351 = arith.mulf %348, %350 : vector<16x128xf32>
    %352 = vector.extract_strided_slice %0 {offsets = [20, 0], sizes = [1, 128], strides = [1, 1]} : vector<40x128xf32> to vector<1x128xf32>
    %353 = vector.broadcast %352 : vector<1x128xf32> to vector<16x128xf32>
    %354 = arith.addf %351, %353 : vector<16x128xf32>
    %355 = arith.truncf %354 : vector<16x128xf32> to vector<16x128xbf16>
    %c13 = arith.constant 13 : index
    %c0_101 = arith.constant 0 : index
    %c0_102 = arith.constant 0 : index
    %356 = vector.load %arg2[%c13, %c0_101, %c0_102] : memref<14x128x128xbf16, #tpu.memory_space<vmem>>, vector<1x128x128xbf16>
    %357 = vector.shape_cast %356 : vector<1x128x128xbf16> to vector<128x128xbf16>
    %cst_103 = arith.constant dense<0.000000e+00> : vector<16x128xf32>
    %358 = tpu.matmul %355, %357, %cst_103 {dimension_numbers = #tpu.dot_dimension_numbers<[1], [0], [0], [1], [0, 0, 1, 1], [], []>} : vector<16x128xbf16>, vector<128x128xbf16>, vector<16x128xf32> -> vector<16x128xf32>
    %359 = vector.extract_strided_slice %0 {offsets = [21, 0], sizes = [1, 128], strides = [1, 1]} : vector<40x128xf32> to vector<1x128xf32>
    %360 = vector.broadcast %359 : vector<1x128xf32> to vector<16x128xf32>
    %361 = arith.addf %358, %360 : vector<16x128xf32>
    %c0_104 = arith.constant 0 : index
    %c0_105 = arith.constant 0 : index
    %362 = vector.load %arg4[%c0_104, %c0_105] : memref<16x128xf32, #tpu.memory_space<vmem>>, vector<16x128xf32>
    tpu.vector_store %arg4[%c0_104, %c0_105], %361 {strides = array<i32>} : memref<16x128xf32, #tpu.memory_space<vmem>>, vector<16x128xf32>,
    return
  }
  func.func @transform_0(%arg0: i32) -> (i32, i32) {
    %c0_i32 = arith.constant 0 : i32
    %c0_i32_0 = arith.constant 0 : i32
    %c0_i32_1 = arith.constant 0 : i32
    return %c0_i32, %c0_i32_0 : i32, i32
  }
  func.func @transform_1(%arg0: i32) -> (i32, i32, i32) {
    %c0_i32 = arith.constant 0 : i32
    %c0_i32_0 = arith.constant 0 : i32
    %c0_i32_1 = arith.constant 0 : i32
    %c0_i32_2 = arith.constant 0 : i32
    return %c0_i32, %c0_i32_0, %c0_i32_1 : i32, i32, i32
  }
  func.func @transform_2(%arg0: i32) -> (i32, i32) {
    %c0_i32 = arith.constant 0 : i32
    %c0_i32_0 = arith.constant 0 : i32
    %c0_i32_1 = arith.constant 0 : i32
    return %c0_i32, %c0_i32_0 : i32, i32
  }
  func.func @transform_3(%arg0: i32) -> (i32, i32) {
    %c0_i32 = arith.constant 0 : i32
    %c0_i32_0 = arith.constant 0 : i32
    %c0_i32_1 = arith.constant 0 : i32
    return %c0_i32, %c0_i32_0 : i32, i32
  }
}

</mosaic_0001>

<bundles_post_ra>
// kernel: transformer_forward.1
= control target key start
LH: loop header
LB: loop body
LE: loop exit
PB: predicated region body
PF: predicated region fallthrough
CT: control target
= control target key end

     0   :  { %8 = vsyncpa [#allocation3], 0  ;;  %s4260_s0 = inlined_call_operand.vmem [shape: s32[16,1], index: 0, kind: input, shape index: {}]   ;;  %s4261_s1 = inlined_call_operand.hbm [shape: bf16[14,128,128], index: 1, kind: input, shape index: {}]   ;;  %s4262_s2 = inlined_call_operand.hbm [shape: f32[40,128], index: 2, kind: input, shape index: {}]   ;;  %s4263_s3 = inlined_call_operand.hbm [shape: f32[16,128], index: 3, kind: output, shape index: {}]  }
   0x1   :  { %9 = vsyncpa [#allocation6], 0 }
   0x2   :  { %10 = vsyncpa [#allocation4], 0  ;;  %s3524_s12 = smov [#allocation2]  }
   0x3   :  { %s18_s13 = sshll.u32 %s3524_s12, 4  ;;  %s19_s13 = int_to_ptr.vmem [resolvable:$true] %s18_s13 }
   0x4   :  { %s3466_s14 = scalar_lea.vmem %s19_s13, 14336  ;;  %p3471_p1 = scmp.lt.s32.totalorder %s19_s13, %s19_s13 }
   0x5   :  { %p3467_p0 = scmp.ne.s32.totalorder %s19_s13, %s3466_s14  ;;  %p3472_p2 = scmp.lt.s32.totalorder %s3466_s14, %s3466_s14 }
   0x7   :  { %p3473_p3 = por %p3472_p2, %p3471_p1 }
   0x9   :  { %p3474_p4 = pnand %p3473_p3, %p3467_p0 }
   0xb   :  { %3477 = shalt.err (!%p3474_p4)
}
   0xc   :  { %s3525_s15 = smov 64   ;;  %s3526_s16 = smov 4  }
   0xd   :  { %24 = dma.hbm_to_vmem [thread:$0]  %s4261_s1, 14336, %s19_s13, [#allocation3], %s3525_s15, %s3525_s15, %s3526_s16  }
   0xe   :  { %s3527_s19 = smov [#allocation5]  }
   0xf   :  { %s30_s20 = sshll.u32 %s3527_s19, 4  ;;  %s31_s20 = int_to_ptr.vmem [resolvable:$true] %s30_s20 }
  0x10   :  { %s3486_s21 = scalar_lea.vmem %s31_s20, 640  ;;  %p3491_p6 = scmp.lt.s32.totalorder %s31_s20, %s31_s20 }
  0x11   :  { %p3487_p5 = scmp.ne.s32.totalorder %s31_s20, %s3486_s21  ;;  %p3492_p7 = scmp.lt.s32.totalorder %s3486_s21, %s3486_s21 }
  0x13   :  { %p3493_p8 = por %p3492_p7, %p3491_p6 }
  0x15   :  { %p3494_p9 = pnand %p3493_p8, %p3487_p5 }
  0x17   :  { %3497 = shalt.err (!%p3494_p9)
}
  0x18   :  { %s3528_s22 = smov 128   ;;  %s3529_s23 = smov 8  }
  0x19   :  { %36 = dma.hbm_to_vmem [thread:$0]  %s4262_s2, 640, %s31_s20, [#allocation6], %s3528_s22, %s3528_s22, %s3529_s23  }
  0x1a   :  { %3518 = dma.done.wait [#allocation3], 14336  }
  0x1b   :  { %3519 = vsyncadd [#allocation3], 4294952960 }
  0x1c   :  { %3520 = dma.done.wait [#allocation6], 640  }
  0x1d   :  { %3521 = vsyncadd [#allocation6], 4294966656  ;;  %v3530_v0 = vmov 0   ;;  %v3531_v1 = vmov 0.0   ;;  %v119_v2 = vld [vmem:[%s4260_s0] sm:$0xff]  ;;  %v120_v3 = vld [vmem:[%s4260_s0 + $0x8] sm:$0xff]  ;;  %v49_v20 = vlaneseq }
  0x1e   :  { %3245 = vset.pattern.permute.xlu0 %v3530_v0  ;;  %2923 = vmatprep.subr.bf16.mxu0 %v3531_v1  ;;  %v3246_v4 = vld [vmem:[#allocation2 + $0x38] sm:$0xff]   ;;  %vm4269_vm0 = vmmov 0   ;;  %v3248_v6 = vld [vmem:[#allocation2 + $0x30] sm:$0xff]   ;;  %v3250_v8 = vld [vmem:[#allocation2 + $0x28] sm:$0xff]   ;;  %v3533_v25 = vmov 1.0|1.0  }
  0x1f   :  { %2943 = vmatprep.subr.bf16.mxu1 %v3531_v1  ;;  %122 = vperm.xlu0 %3245, %v119_v2   ;;  %v3247_v5 = vld [vmem:[#allocation2 + $0x78] sm:$0xff]   ;;  %v3249_v7 = vld [vmem:[#allocation2 + $0x70] sm:$0xff]   ;;  %v3251_v9 = vld [vmem:[#allocation2 + $0x68] sm:$0xff]   ;;  %v3594_v22 = vand.u32 127, %v49_v20  ;;  %v3617_v45 = vshrl.u32 %v49_v20, 7  ;;  %vm4271_vm11 = vcmask 261120  }
  0x20   :  { %2939 = vmatprep.mubr.msk.bf16.mxu0 %vm4269_vm0, %v3531_v1  ;;  %2959 = vmatprep.mubr.msk.bf16.mxu1 %vm4269_vm0, %v3531_v1  ;;  %v3252_v10 = vld [vmem:[#allocation2 + $0x20] sm:$0xff]   ;;  %v3254_v12 = vld [vmem:[#allocation2 + $0x18] sm:$0xff]   ;;  %v3256_v14 = vld [vmem:[#allocation2 + $0x10] sm:$0xff]   ;;  %s3534_s0 = smov 96   ;;  %vm4274_vm15 = vcmask 130048   ;;  %s3535_s2 = smov [#allocation7]  }
  0x21   :  { %2924 = vmatpush3.bf16.msra.mxu0 %v3246_v4  ;;  %2944 = vmatpush3.bf16.msra.mxu1 %v3247_v5  ;;  %v3253_v11 = vld [vmem:[#allocation2 + $0x60] sm:$0xff]   ;;  %v3255_v13 = vld [vmem:[#allocation2 + $0x58] sm:$0xff]   ;;  %v3257_v15 = vld [vmem:[#allocation2 + $0x50] sm:$0xff]   ;;  %v3620_v46 = vsub.s32 0, %v3617_v45  ;;  %v3625_v48 = vadd.s32 32, %v3617_v45  ;;  %v3628_v49 = vadd.s32 16, %v3617_v45 }
  0x22   :  { %2925 = vmatprep.subr.bf16.mxu0 %v3531_v1  ;;  %2945 = vmatprep.subr.bf16.mxu1 %v3531_v1  ;;  %v3258_v16 = vld [vmem:[#allocation2 + $0x8] sm:$0xff]   ;;  %v3260_v18 = vld [vmem:[#allocation2] sm:$0xff]   ;;  %v3262_v24 = vld [vmem:[#allocation2 + $0xb8] sm:$0xff]   ;;  %v3631_v50 = vadd.s32 48, %v3617_v45  ;;  %v3634_v51 = vadd.s32 8, %v3617_v45  ;;  %v3637_v52 = vadd.s32 40, %v3617_v45 }
  0x23   :  { %125 = vperm.xlu0 %3245, %v120_v3   ;;  %v3259_v17 = vld [vmem:[#allocation2 + $0x48] sm:$0xff]   ;;  %v3261_v19 = vld [vmem:[#allocation2 + $0x40] sm:$0xff]   ;;  %v3263_v26 = vld [vmem:[#allocation2 + $0xb0] sm:$0xff]   ;;  %v3640_v53 = vadd.s32 24, %v3617_v45  ;;  %v3643_v54 = vadd.s32 56, %v3617_v45  ;;  %v3646_v55 = vshra.s32 %v3594_v22, 3 }
  0x24   :  { %v3264_v27 = vld [vmem:[#allocation2 + $0xa8] sm:$0xff]   ;;  %v3265_v28 = vld [vmem:[#allocation2 + $0xa0] sm:$0xff]   ;;  %v3266_v29 = vld [vmem:[#allocation2 + $0x98] sm:$0xff]   ;;  %v61_v57 = vshra.s32 %v3617_v45, 4  ;;  %v65_v58 = vshra.s32 %v3625_v48, 4  ;;  %v63_v59 = vshra.s32 %v3628_v49, 4 }
  0x25   :  { %2926 = vmatpush3.bf16.msra.mxu0 %v3248_v6  ;;  %2946 = vmatpush3.bf16.msra.mxu1 %v3249_v7  ;;  %v3267_v30 = vld [vmem:[#allocation2 + $0x90] sm:$0xff]   ;;  %v3268_v31 = vld [vmem:[#allocation2 + $0x88] sm:$0xff]   ;;  %v3269_v32 = vld [vmem:[#allocation2 + $0x80] sm:$0xff]   ;;  %v67_v60 = vshra.s32 %v3631_v50, 4  ;;  %v62_v62 = vshra.s32 %v3634_v51, 4  ;;  %v66_v63 = vshra.s32 %v3637_v52, 4 }
  0x26   :  { %2927 = vmatprep.subr.bf16.mxu0 %v3531_v1  ;;  %2947 = vmatprep.subr.bf16.mxu1 %v3531_v1  ;;  %v47_v35 = vld [vmem:[#allocation5 + $0x18] sm:$0xff]  ;;  %v3622_v47 = vld [vmem:[#allocation5] sm:$0xff]  ;;  %v64_v0 = vshra.s32 %v3640_v53, 4  ;;  %v68_v2 = vshra.s32 %v3643_v54, 4  ;;  %vm3659_vm4 = vcmp.eq.s32.totalorder %v61_v57, %v3646_v55  ;;  %vm3664_vm5 = vcmp.eq.s32.totalorder %v65_v58, %v3646_v55  ;;  %s2645_s29 = sshll.u32 %s3535_s2, 4  ;;  %s2646_s29 = int_to_ptr.vmem [resolvable:$true] %s2645_s29 }
  0x27   :  { %v366_v56 = vrot.slane %v3622_v47, %v3620_v46  ;;  %vm3669_vm6 = vcmp.eq.s32.totalorder %v63_v59, %v3646_v55  ;;  %vm3674_vm7 = vcmp.eq.s32.totalorder %v67_v60, %v3646_v55  ;;  %vm3679_vm8 = vcmp.eq.s32.totalorder %v62_v62, %v3646_v55  ;;  %s3498_s30 = scalar_lea.vmem %s2646_s29, 256  ;;  %p3503_p11 = scmp.lt.s32.totalorder %s2646_s29, %s2646_s29 }
  0x28   :  { %vm3684_vm9 = vcmp.eq.s32.totalorder %v66_v63, %v3646_v55  ;;  %vm3689_vm10 = vcmp.eq.s32.totalorder %v64_v0, %v3646_v55  ;;  %vm3694_vm12 = vcmp.eq.s32.totalorder %v68_v2, %v3646_v55  ;;  %v85_v0 = vand.u32 15, %v3643_v54  ;;  %p3499_p10 = scmp.ne.s32.totalorder %s2646_s29, %s3498_s30  ;;  %p3504_p12 = scmp.lt.s32.totalorder %s3498_s30, %s3498_s30 }
  0x29   :  { %2928 = vmatpush3.bf16.msra.mxu0 %v3250_v8  ;;  %2948 = vmatpush3.bf16.msra.mxu1 %v3251_v9  ;;  %v4289_v8 = vmov 0  ;;  %v82_v2 = vand.u32 15, %v3625_v48 }
  0x2a   :  { %2929 = vmatprep.subr.bf16.mxu0 %v3531_v1  ;;  %2949 = vmatprep.subr.bf16.mxu1 %v3531_v1  ;;  %v4290_v8 = vsel %vm3674_vm7, 4294967295, %v4289_v8  ;;  %p3505_p13 = por %p3504_p12, %p3503_p11 }
  0x2c   :  { %p3506_p0 = pnand %p3505_p13, %p3499_p10 }
  0x2d   :  { %2930 = vmatpush3.bf16.msra.mxu0 %v3252_v10  ;;  %2950 = vmatpush3.bf16.msra.mxu1 %v3253_v11  ;;  %v4293_v11 = vmov 0 }
  0x2e   :  { %2931 = vmatprep.subr.bf16.mxu0 %v3531_v1  ;;  %2951 = vmatprep.subr.bf16.mxu1 %v3531_v1  ;;  %v4294_v11 = vsel %vm3684_vm9, 4294967295, %v4293_v11 }
  0x31   :  { %2932 = vmatpush3.bf16.msra.mxu0 %v3254_v12  ;;  %2952 = vmatpush3.bf16.msra.mxu1 %v3255_v13  ;;  %v4198_v12 = vld [vmem:[#allocation5 + $0x8] sm:$0xff] }
  0x32   :  { %2933 = vmatprep.subr.bf16.mxu0 %v3531_v1  ;;  %2953 = vmatprep.subr.bf16.mxu1 %v3531_v1 }
  0x35   :  { %2934 = vmatpush3.bf16.msra.mxu0 %v3256_v14  ;;  %2954 = vmatpush3.bf16.msra.mxu1 %v3257_v15  ;;  %v4297_v14 = vmov 0 }
  0x36   :  { %2935 = vmatprep.subr.bf16.mxu0 %v3531_v1  ;;  %2955 = vmatprep.subr.bf16.mxu1 %v3531_v1  ;;  %v4298_v14 = vsel %vm3694_vm12, 4294967295, %v4297_v14 }
  0x39   :  { %2936 = vmatpush3.bf16.msra.mxu0 %v3258_v16  ;;  %2956 = vmatpush3.bf16.msra.mxu1 %v3259_v17 }
  0x3a   :  { %2937 = vmatprep.subr.bf16.mxu0 %v3531_v1  ;;  %2957 = vmatprep.subr.bf16.mxu1 %v3531_v1 }
  0x3d   :  { %2938 = vmatpush3.bf16.msra.mxu0 %v3260_v18  ;;  %2958 = vmatpush3.bf16.msra.mxu1 %v3261_v19 }
  0x3e   :  { %2963 = vmatprep.subr.bf16.mxu0 %v3531_v1 }
  0x9a   :  { %v123_v21 = vpop.permute.xlu0 %122 }
  0x9b   :  { %vm127_vm1 = vcmp.eq.s32.totalorder %v3594_v22, %v123_v21 }
  0x9e   :  { %v126_v23 = vpop.permute.xlu0 %125 }
  0x9f   :  { %vm128_vm2 = vcmp.eq.s32.totalorder %v3594_v22, %v126_v23 }
  0xa0   :  { %vm2668_vm3 = vmpackc.low %vm128_vm2, %vm127_vm1 }
  0xa1   :  { %2940 = vmatmul.mubr.msk.bf16.vlgmr.msra.gmra.mxu0 %vm2668_vm3, %v3533_v25  ;;  %2960 = vmatmul.mubr.msk.bf16.vlgmr.msra.gmra.mxu1 %vm2668_vm3, %v3533_v25 }
  0xa2   :  { %2964 = vmatpush3.bf16.msra.mxu0 %v3262_v24  ;;  %2979 = vmatprep.mubr.msk.bf16.mxu0 %vm4269_vm0, %v3531_v1 }
  0xa3   :  { %2965 = vmatprep.subr.bf16.mxu0 %v3531_v1 }
  0xa6   :  { %2966 = vmatpush3.bf16.msra.mxu0 %v3263_v26 }
  0xa7   :  { %2967 = vmatprep.subr.bf16.mxu0 %v3531_v1 }
  0xaa   :  { %2968 = vmatpush3.bf16.msra.mxu0 %v3264_v27 }
  0xab   :  { %2969 = vmatprep.subr.bf16.mxu0 %v3531_v1 }
  0xae   :  { %2970 = vmatpush3.bf16.msra.mxu0 %v3265_v28 }
  0xaf   :  { %2971 = vmatprep.subr.bf16.mxu0 %v3531_v1 }
  0xb2   :  { %2972 = vmatpush3.bf16.msra.mxu0 %v3266_v29 }
  0xb3   :  { %2973 = vmatprep.subr.bf16.mxu0 %v3531_v1 }
  0xb6   :  { %2974 = vmatpush3.bf16.msra.mxu0 %v3267_v30 }
  0xb7   :  { %2975 = vmatprep.subr.bf16.mxu0 %v3531_v1 }
  0xba   :  { %2976 = vmatpush3.bf16.msra.mxu0 %v3268_v31 }
  0xbb   :  { %2977 = vmatprep.subr.bf16.mxu0 %v3531_v1 }
  0xbe   :  { %2978 = vmatpush3.bf16.msra.mxu0 %v3269_v32  ;;  %v78_v32 = vand.u32 15, %v3617_v45 }
 0x161   :  { %v232_v33 = vpop.f32.mrf.mxu0  ;;  %v3607_v34 = vpop.f32.mrf.mxu1 }
 0x162   :  { %v3611_v40 = vadd.f32 %v232_v33, %v47_v35  ;;  %v81_v33 = vand.u32 15, %v3640_v53 }
 0x163   :  { %v2941_v36 = vpop.f32.mrf.mxu0  ;;  %v2961_v37 = vpop.f32.mrf.mxu1 }
 0x164   :  { %v79_v36 = vand.u32 15, %v3634_v51  ;;  %v80_v37 = vand.u32 15, %v3628_v49 }
 0x165   :  { %v235_v38 = vpop.f32.mrf.mxu0  ;;  %v3609_v39 = vpop.f32.mrf.mxu1 }
 0x166   :  { %v3613_v41 = vadd.f32 %v235_v38, %v47_v35  ;;  %v3730_v35 = vshra.s32 %v78_v32, 3  ;;  %v3739_v58 = vshra.s32 %v79_v36, 3  ;;  %v3741_v60 = vshra.s32 %v80_v37, 3 }
 0x167   :  { %v2942_v42 = vpop.f32.mrf.mxu0  ;;  %v2962_v43 = vpop.f32.mrf.mxu1 }
 0x168   :  { %v345_v44 = vpack.c.bf16 %v3613_v41, %v3611_v40  ;;  %v3734_v43 = vshra.s32 %v81_v33, 3  ;;  %vm4277_vm13 = vcmp.eq.s32.totalorder %v3730_v35, %v3646_v55  ;;  %vm4265_vm1 = vcmp.eq.s32.totalorder %v3739_v58, %v3646_v55 }
 0x169   :  { %vm4278_vm3 = vcmp.eq.s32.totalorder %v3741_v60, %v3646_v55 }
 0x16a   :  { %2980 = vmatmul.mubr.bf16.vlgmr.msra.gmra.mxu0 %v345_v44  ;;  %v83_v44 = vand.u32 15, %v3637_v52  ;;  %vm4264_vm14 = vcmp.eq.s32.totalorder %v3734_v43, %v3646_v55 }
 0x16c   :  { %v3745_v63 = vshra.s32 %v83_v44, 3 }
 0x16e   :  { %vm4266_vm2 = vcmp.eq.s32.totalorder %v3745_v63, %v3646_v55 }
 0x22a   :  { %v449_v61 = vpop.f32.mrf.mxu0 }
 0x22b   :  { %v450_v3 = vadd.f32 %v449_v61, %v366_v56 }
 0x22c   :  { %v2981_v4 = vpop.f32.mrf.mxu0 }
 0x22d   :  { %v456_v16 = vsel %vm3659_vm4, %v450_v3, 0.0  ;;  %v460_v17 = vsel %vm3664_vm5, %v450_v3, 0.0  ;;  %v458_v18 = vsel %vm3669_vm6, %v450_v3, 0.0  ;;  %v462_v19 = vsel %vm3674_vm7, %v450_v3, 0.0 }
 0x22e   :  { %v452_v9 = vpop.f32.mrf.mxu0 }
 0x22f   :  { %v453_v13 = vadd.f32 %v452_v9, %v366_v56 }
 0x230   :  { %v2982_v15 = vpop.f32.mrf.mxu0 }
 0x231   :  { %v3706_v20 = vpack.c.bf16 %v453_v13, %v450_v3  ;;  %v457_v21 = vsel %vm3679_vm8, %v453_v13, 0.0  ;;  %v461_v23 = vsel %vm3684_vm9, %v453_v13, 0.0  ;;  %v459_v24 = vsel %vm3689_vm10, %v453_v13, 0.0 }
 0x232   :  { %v464_v25 = vpack.c.bf16 %v457_v21, %v456_v16  ;;  %v466_v26 = vpack.c.bf16 %v461_v23, %v460_v17  ;;  %v465_v27 = vpack.c.bf16 %v459_v24, %v458_v18  ;;  %v463_v28 = vsel %vm3694_vm12, %v453_v13, 0.0 }
 0x233   :  { %470 = vrot.lane.b32.xlu1 %v3706_v20, %s3534_s0  ;;  %v467_v29 = vpack.c.bf16 %v463_v28, %v462_v19  ;;  %v84_v17 = vand.u32 15, %v3631_v50  ;;  %v3763_v23 = vshra.s32 %v85_v0, 3  ;;  %v3765_v24 = vshra.s32 %v82_v2, 3 }
 0x234   :  { %2985 = vmatprep.mubr.msk.bf16.mxu0 %vm4271_vm11, %v464_v25  ;;  %2989 = vmatprep.mubr.msk.bf16.mxu1 %vm4271_vm11, %v466_v26 }
 0x235   :  { %v3782_v32 = vshra.s32 %v84_v17, 3 }
 0x2a5   :  { %v471_v30 = vpop.permute.xlu1 %470 }
 0x2a6   :  { %3229 = vmatprep.subr.msk.bf16.mxu0 %vm4271_vm11, %v471_v30  ;;  %3230 = vmatprep.subr.msk.bf16.mxu1 %vm4271_vm11, %v471_v30  ;;  %v486_v31 = vsel %vm4271_vm11, %v471_v30, 0 }
 0x2a7   :  { %2984 = vmatpush3.bf16.xpose.msra.mxu0 %v486_v31  ;;  %3228 = vmatpush3.bf16.xpose.msra.mxu1 %v486_v31 }
 0x2a8   :  { %3003 = vmatprep.subr.bf16.mxu0 %v3531_v1 }
 0x2ae   :  { %2986 = vmatmul.mubr.msk.bf16.vlgmr.msra.gmra.mxu0 %vm4271_vm11, %v465_v27  ;;  %2990 = vmatmul.mubr.msk.bf16.vlgmr.msra.gmra.mxu1 %vm4271_vm11, %v467_v29 }
 0x2af   :  { %3007 = vmatprep.mubr.msk.bf16.mxu0 %vm4269_vm0, %v3531_v1 }
 0x36e   :  { %v2987_v38 = vpop.f32.mrf.mxu0  ;;  %v2991_v42 = vpop.f32.mrf.mxu1 }
 0x36f   :  { %v555_v9 = vmul.f32 0.35355338, %v2987_v38  ;;  %v559_v37 = vmul.f32 0.35355338, %v2991_v42 }
 0x370   :  { %v522_v56 = vpop.f32.mrf.mxu0  ;;  %v538_v57 = vpop.f32.mrf.mxu1 }
 0x371   :  { %v553_v59 = vmul.f32 0.35355338, %v522_v56  ;;  %v557_v26 = vmul.f32 0.35355338, %v538_v57  ;;  %v563_v31 = vsel %vm4278_vm3, %v555_v9, -1e+30 }
 0x372   :  { %v2988_v61 = vpop.f32.mrf.mxu0  ;;  %v2992_v62 = vpop.f32.mrf.mxu1  ;;  %v576_v36 = vsel %vm4274_vm15, %v563_v31, -inf }
 0x373   :  { %v556_v3 = vmul.f32 0.35355338, %v2988_v61  ;;  %v561_v4 = vsel %vm4277_vm13, %v553_v59, -1e+30  ;;  %v560_v29 = vmul.f32 0.35355338, %v2992_v62 }
 0x374   :  { %v525_v13 = vpop.f32.mrf.mxu0  ;;  %v541_v15 = vpop.f32.mrf.mxu1  ;;  %v570_v16 = vsel %vm4274_vm15, %v561_v4, -inf }
 0x375   :  { %v554_v18 = vmul.f32 0.35355338, %v525_v13  ;;  %v558_v19 = vmul.f32 0.35355338, %v541_v15  ;;  %571 = vmax.xlane.f32.xlu1 %v570_v16  ;;  %v564_v21 = vsel %vm4264_vm14, %v556_v3, -1e+30  ;;  %vm4272_vm14 = vcmp.eq.s32.totalorder %v3763_v23, %v3646_v55 }
 0x376   :  { %v579_v27 = vsel %vm4274_vm15, %v564_v21, -inf  ;;  %v568_v38 = vsel %vm4272_vm14, %v560_v29, -1e+30 }
 0x377   :  { %v562_v25 = vsel %vm4265_vm1, %v554_v18, -1e+30  ;;  %v566_v30 = vsel %vm4266_vm2, %v558_v19, -1e+30  ;;  %vm4273_vm1 = vcmp.eq.s32.totalorder %v3765_v24, %v3646_v55  ;;  %vm4267_vm2 = vcmp.eq.s32.totalorder %v3782_v32, %v3646_v55 }
 0x378   :  { %v573_v28 = vsel %vm4274_vm15, %v562_v25, -inf  ;;  %v585_v33 = vsel %vm4274_vm15, %v566_v30, -inf  ;;  %v565_v44 = vsel %vm4273_vm1, %v557_v26, -1e+30  ;;  %v591_v56 = vsel %vm4274_vm15, %v568_v38, -inf }
 0x379   :  { %580 = vmax.xlane.f32.xlu1 %v579_v27  ;;  %574 = vmax.xlane.f32.xlu0 %v573_v28  ;;  %v582_v57 = vsel %vm4274_vm15, %v565_v44, -inf  ;;  %v567_v42 = vsel %vm4267_vm2, %v559_v37, -1e+30  ;;  %vm4268_vm2 = vcmp.lt.s32.totalorder %v3594_v22, 32 }
 0x37a   :  { %v588_v59 = vsel %vm4274_vm15, %v567_v42, -inf }
 0x37d   :  { %586 = vmax.xlane.f32.xlu1 %v585_v33  ;;  %577 = vmax.xlane.f32.xlu0 %v576_v36 }
 0x381   :  { %592 = vmax.xlane.f32.xlu1 %v591_v56  ;;  %583 = vmax.xlane.f32.xlu0 %v582_v57 }
 0x385   :  { %589 = vmax.xlane.f32.xlu0 %v588_v59 }
 0x3fe   :  { %v572_v61 = vpop.xlane.xlu1 %571 }
 0x3ff   :  { %v594_v9 = vsub.f32 %v561_v4, %v572_v61 }
 0x401   :  { %v602_v26 = vmul.f32 1.442695, %v594_v9 }
 0x402   :  { %v581_v62 = vpop.xlane.xlu1 %580  ;;  %v575_v0 = vpop.xlane.xlu0 %574 }
 0x403   :  { %v597_v2 = vsub.f32 %v564_v21, %v581_v62  ;;  %v595_v3 = vsub.f32 %v562_v25, %v575_v0 }
 0x405   :  { %v604_v13 = vmul.f32 1.442695, %v595_v3  ;;  %v608_v15 = vmul.f32 1.442695, %v597_v2 }
 0x406   :  { %v587_v16 = vpop.xlane.xlu1 %586  ;;  %v578_v17 = vpop.xlane.xlu0 %577 }
 0x407   :  { %v599_v18 = vsub.f32 %v566_v30, %v587_v16  ;;  %v596_v19 = vsub.f32 %v563_v31, %v578_v17  ;;  %3340 = vpow2.f32 %v604_v13 }
 0x408   :  { %3342 = vpow2.f32 %v608_v15 }
 0x409   :  { %v606_v27 = vmul.f32 1.442695, %v596_v19  ;;  %v612_v28 = vmul.f32 1.442695, %v599_v18 }
 0x40a   :  { %v593_v29 = vpop.xlane.xlu1 %592  ;;  %v584_v33 = vpop.xlane.xlu0 %583 }
 0x40b   :  { %v601_v36 = vsub.f32 %v568_v38, %v593_v29  ;;  %v598_v37 = vsub.f32 %v565_v44, %v584_v33  ;;  %3344 = vpow2.f32 %v606_v27 }
 0x40c   :  { %3346 = vpow2.f32 %v602_v26 }
 0x40d   :  { %v616_v21 = vmul.f32 1.442695, %v601_v36  ;;  %3348 = vpow2.f32 %v612_v28  ;;  %v610_v4 = vmul.f32 1.442695, %v598_v37 }
 0x40e   :  { %v590_v25 = vpop.xlane.xlu0 %589 }
 0x40f   :  { %v600_v56 = vsub.f32 %v567_v42, %v590_v25  ;;  %3350 = vpow2.f32 %v616_v21 }
 0x410   :  { %3352 = vpow2.f32 %v610_v4 }
 0x411   :  { %v614_v30 = vmul.f32 1.442695, %v600_v56 }
 0x413   :  { %3354 = vpow2.f32 %v614_v30 }
 0x414   :  { %v3341_v31 = vpop.eup %3340 }
 0x415   :  { %v621_v57 = vsel %vm4274_vm15, %v3341_v31, 0.0  ;;  %v3343_v59 = vpop.eup %3342 }
 0x416   :  { %622 = vadd.xlane.f32.xlu1 %v621_v57  ;;  %v627_v38 = vsel %vm4274_vm15, %v3343_v59, 0.0 }
 0x418   :  { %v3345_v61 = vpop.eup %3344 }
 0x419   :  { %v3347_v62 = vpop.eup %3346  ;;  %v624_v44 = vsel %vm4274_vm15, %v3345_v61, 0.0 }
 0x41a   :  { %v3349_v0 = vpop.eup %3348  ;;  %628 = vadd.xlane.f32.xlu1 %v627_v38  ;;  %625 = vadd.xlane.f32.xlu0 %v624_v44  ;;  %v618_v3 = vsel %vm4274_vm15, %v3347_v62, 0.0 }
 0x41b   :  { %v633_v42 = vsel %vm4274_vm15, %v3349_v0, 0.0 }
 0x41c   :  { %v3351_v2 = vpop.eup %3350 }
 0x41d   :  { %v3353_v9 = vpop.eup %3352  ;;  %v639_v13 = vsel %vm4274_vm15, %v3351_v2, 0.0 }
 0x41e   :  { %634 = vadd.xlane.f32.xlu1 %v633_v42  ;;  %619 = vadd.xlane.f32.xlu0 %v618_v3  ;;  %v630_v15 = vsel %vm4274_vm15, %v3353_v9, 0.0 }
 0x420   :  { %v3355_v16 = vpop.eup %3354 }
 0x421   :  { %v636_v17 = vsel %vm4274_vm15, %v3355_v16, 0.0 }
 0x422   :  { %640 = vadd.xlane.f32.xlu1 %v639_v13  ;;  %631 = vadd.xlane.f32.xlu0 %v630_v15 }
 0x426   :  { %637 = vadd.xlane.f32.xlu0 %v636_v17 }
 0x43c   :  { %662 = vrot.lane.b32.xlu0 %v3706_v20, %s3525_s15 }
 0x49f   :  { %v623_v18 = vpop.xlane.xlu1 %622 }
 0x4a3   :  { %v629_v19 = vpop.xlane.xlu1 %628  ;;  %v626_v26 = vpop.xlane.xlu0 %625 }
 0x4a4   :  { %3356 = vrcp.f32 %v629_v19 }
 0x4a5   :  { %3358 = vrcp.f32 %v626_v26 }
 0x4a6   :  { %3360 = vrcp.f32 %v623_v18 }
 0x4a7   :  { %v635_v27 = vpop.xlane.xlu1 %634  ;;  %v620_v28 = vpop.xlane.xlu0 %619 }
 0x4a8   :  { %3362 = vrcp.f32 %v620_v28 }
 0x4a9   :  { %3364 = vrcp.f32 %v635_v27 }
 0x4ab   :  { %v641_v29 = vpop.xlane.xlu1 %640  ;;  %v632_v33 = vpop.xlane.xlu0 %631 }
 0x4ac   :  { %3366 = vrcp.f32 %v632_v33 }
 0x4ad   :  { %3368 = vrcp.f32 %v641_v29 }
 0x4af   :  { %v638_v36 = vpop.xlane.xlu0 %637 }
 0x4b0   :  { %3370 = vrcp.f32 %v638_v36 }
 0x4b1   :  { %v3357_v37 = vpop.eup %3356 }
 0x4b2   :  { %v3359_v21 = vpop.eup %3358  ;;  %v653_v30 = vmul.f32 %v3357_v37, %v3343_v59 }
 0x4b3   :  { %v663_v4 = vpop.permute.xlu0 %662  ;;  %v3361_v20 = vpop.eup %3360  ;;  %v652_v56 = vmul.f32 %v3359_v21, %v3345_v61 }
 0x4b4   :  { %2993 = vmatprep.subr.bf16.mxu1 %v663_v4  ;;  %v651_v38 = vmul.f32 %v3361_v20, %v3341_v31  ;;  %v3270_v31 = vld [vmem:[#allocation2 + $0xc8] sm:$0xff]  }
 0x4b5   :  { %2994 = vmatpush3.bf16.msra.mxu1 %v663_v4  ;;  %v3363_v25 = vpop.eup %3362  ;;  %v659_v13 = vpack.c.bf16 %v653_v30, %v652_v56  ;;  %3004 = vmatpush3.bf16.msra.mxu0 %v3270_v31 }
 0x4b6   :  { %3011 = vmatprep.subr.bf16.mxu1 %v3531_v1  ;;  %v650_v57 = vmul.f32 %v3363_v25, %v3347_v62  ;;  %v3365_v44 = vpop.eup %3364  ;;  %3005 = vmatprep.subr.bf16.mxu0 %v3531_v1  ;;  %v3271_v62 = vld [vmem:[#allocation2 + $0xc0] sm:$0xff]  }
 0x4b7   :  { %v655_v18 = vmul.f32 %v3365_v44, %v3349_v0 }
 0x4b8   :  { %v658_v42 = vpack.c.bf16 %v651_v38, %v650_v57 }
 0x4b9   :  { %v3367_v3 = vpop.eup %3366  ;;  %3006 = vmatpush3.bf16.msra.mxu0 %v3271_v62 }
 0x4ba   :  { %v3369_v15 = vpop.eup %3368  ;;  %2995 = vmatprep.mubr.msk.bf16.mxu1 %vm4274_vm15, %v658_v42  ;;  %v654_v17 = vmul.f32 %v3367_v3, %v3353_v9  ;;  %3031 = vmatprep.subr.bf16.mxu0 %v3531_v1 }
 0x4bb   :  { %2996 = vmatmul.mubr.msk.bf16.vlgmr.msra.gmra.mxu1 %vm4274_vm15, %v659_v13  ;;  %v657_v61 = vmul.f32 %v3369_v15, %v3351_v2 }
 0x4bc   :  { %v660_v26 = vpack.c.bf16 %v655_v18, %v654_v17  ;;  %v3839_v18 = vsub.s32 1, %v3617_v45 }
 0x4bd   :  { %v3371_v19 = vpop.eup %3370 }
 0x4be   :  { %v656_v27 = vmul.f32 %v3371_v19, %v3355_v16  ;;  %2999 = vmatprep.mubr.msk.bf16.mxu1 %vm4274_vm15, %v660_v26  ;;  %v765_v19 = vrot.slane %v3622_v47, %v3839_v18 }
 0x4c0   :  { %v661_v59 = vpack.c.bf16 %v657_v61, %v656_v27 }
 0x4c3   :  { %3000 = vmatmul.mubr.msk.bf16.gmra.mxu1 %vm4274_vm15, %v661_v59 }
 0x4c4   :  { %3027 = vmatprep.mubr.msk.bf16.mxu1 %vm4269_vm0, %v3531_v1 }
 0x57b   :  { %v2997_v0 = vpop.f32.mrf.mxu1 }
 0x57c   :  { %v744_v36 = vsel %vm3669_vm6, %v2997_v0, 0.0 }
 0x57d   :  { %v711_v9 = vpop.f32.mrf.mxu1 }
 0x57e   :  { %v742_v29 = vsel %vm3659_vm4, %v711_v9, 0.0 }
 0x57f   :  { %v2998_v16 = vpop.f32.mrf.mxu1  ;;  %v750_v4 = vadd.f32 %v744_v36, %v742_v29 }
 0x580   :  { %v745_v25 = vsel %vm3689_vm10, %v2998_v16, 0.0  ;;  %v3272_v16 = vld [vmem:[#allocation2 + $0x138] sm:$0xff]  }
 0x581   :  { %v714_v2 = vpop.f32.mrf.mxu1  ;;  %3012 = vmatpush3.bf16.msra.mxu1 %v3272_v16 }
 0x582   :  { %v743_v37 = vsel %vm3679_vm8, %v714_v2, 0.0  ;;  %3013 = vmatprep.subr.bf16.mxu1 %v3531_v1 }
 0x583   :  { %v3001_v28 = vpop.f32.mrf.mxu1  ;;  %v751_v56 = vadd.f32 %v745_v25, %v743_v37  ;;  %v3274_v25 = vld [vmem:[#allocation2 + $0x128] sm:$0xff]  }
 0x584   :  { %v748_v42 = vsel %vm3674_vm7, %v3001_v28, 0.0 }
 0x585   :  { %v727_v33 = vpop.f32.mrf.mxu1 }
 0x586   :  { %v746_v21 = vsel %vm3664_vm5, %v727_v33, 0.0 }
 0x587   :  { %v3002_v20 = vpop.f32.mrf.mxu1  ;;  %v752_v30 = vadd.f32 %v750_v4, %v746_v21 }
 0x588   :  { %v749_v3 = vsel %vm3694_vm12, %v3002_v20, 0.0  ;;  %v3273_v20 = vld [vmem:[#allocation2 + $0x130] sm:$0xff]  }
 0x589   :  { %v730_v57 = vpop.f32.mrf.mxu1  ;;  %v754_v13 = vadd.f32 %v752_v30, %v748_v42  ;;  %3014 = vmatpush3.bf16.msra.mxu1 %v3273_v20  ;;  %v3276_v30 = vld [vmem:[#allocation2 + $0x118] sm:$0xff]  }
 0x58a   :  { %v747_v38 = vsel %vm3684_vm9, %v730_v57, 0.0  ;;  %3015 = vmatprep.subr.bf16.mxu1 %v3531_v1  ;;  %v3277_v57 = vld [vmem:[#allocation2 + $0x110] sm:$0xff]   ;;  %v3288_v42 = vld [vmem:[#allocation2 + $0x178] sm:$0xff]  }
 0x58b   :  { %v753_v44 = vadd.f32 %v751_v56, %v747_v38  ;;  %v3275_v56 = vld [vmem:[#allocation2 + $0x120] sm:$0xff]   ;;  %v3278_v38 = vld [vmem:[#allocation2 + $0x108] sm:$0xff]   ;;  %v3280_v20 = vld [vmem:[#allocation2 + $0x1b8] sm:$0xff]  }
 0x58d   :  { %v755_v15 = vadd.f32 %v753_v44, %v749_v3  ;;  %3016 = vmatpush3.bf16.msra.mxu1 %v3274_v25  ;;  %v3279_v44 = vld [vmem:[#allocation2 + $0x100] sm:$0xff]   ;;  %v3289_v3 = vld [vmem:[#allocation2 + $0x170] sm:$0xff]  }
 0x58e   :  { %3017 = vmatprep.subr.bf16.mxu1 %v3531_v1  ;;  %v3281_v25 = vld [vmem:[#allocation2 + $0x1b0] sm:$0xff]  }
 0x58f   :  { %v756_v17 = vpack.c.bf16 %v755_v15, %v754_v13  ;;  %v3290_v13 = vld [vmem:[#allocation2 + $0x168] sm:$0xff]   ;;  %v3291_v15 = vld [vmem:[#allocation2 + $0x160] sm:$0xff]  }
 0x591   :  { %3008 = vmatmul.mubr.msk.bf16.vlgmr.msra.gmra.mxu0 %vm4271_vm11, %v756_v17  ;;  %3018 = vmatpush3.bf16.msra.mxu1 %v3275_v56  ;;  %v3292_v17 = vld [vmem:[#allocation2 + $0x158] sm:$0xff]   ;;  %v3283_v56 = vld [vmem:[#allocation2 + $0x1a0] sm:$0xff]  }
 0x592   :  { %3047 = vmatprep.mubr.msk.bf16.mxu0 %vm4269_vm0, %v3531_v1  ;;  %3019 = vmatprep.subr.bf16.mxu1 %v3531_v1 }
 0x593   :  { %3032 = vmatpush3.bf16.msra.mxu0 %v3288_v42  ;;  %v3287_v42 = vld [vmem:[#allocation2 + $0x180] sm:$0xff]  }
 0x594   :  { %3033 = vmatprep.subr.bf16.mxu0 %v3531_v1 }
 0x595   :  { %3020 = vmatpush3.bf16.msra.mxu1 %v3276_v30  ;;  %v3284_v30 = vld [vmem:[#allocation2 + $0x198] sm:$0xff]  }
 0x596   :  { %3021 = vmatprep.subr.bf16.mxu1 %v3531_v1 }
 0x597   :  { %3034 = vmatpush3.bf16.msra.mxu0 %v3289_v3 }
 0x598   :  { %3035 = vmatprep.subr.bf16.mxu0 %v3531_v1 }
 0x599   :  { %3022 = vmatpush3.bf16.msra.mxu1 %v3277_v57  ;;  %v3285_v57 = vld [vmem:[#allocation2 + $0x190] sm:$0xff]  }
 0x59a   :  { %3023 = vmatprep.subr.bf16.mxu1 %v3531_v1 }
 0x59b   :  { %3036 = vmatpush3.bf16.msra.mxu0 %v3290_v13 }
 0x59c   :  { %3037 = vmatprep.subr.bf16.mxu0 %v3531_v1 }
 0x59d   :  { %3024 = vmatpush3.bf16.msra.mxu1 %v3278_v38  ;;  %v3286_v38 = vld [vmem:[#allocation2 + $0x188] sm:$0xff]  }
 0x59e   :  { %3025 = vmatprep.subr.bf16.mxu1 %v3531_v1 }
 0x59f   :  { %3038 = vmatpush3.bf16.msra.mxu0 %v3291_v15 }
 0x5a0   :  { %3039 = vmatprep.subr.bf16.mxu0 %v3531_v1 }
 0x5a1   :  { %3026 = vmatpush3.bf16.msra.mxu1 %v3279_v44  ;;  %v48_v44 = vld [vmem:[#allocation5 + $0x20] sm:$0xff] }
 0x5a2   :  { %3051 = vmatprep.subr.bf16.mxu1 %v3531_v1  ;;  %v3888_v3 = vadd.f32 %v3609_v39, %v48_v44  ;;  %v3892_v13 = vadd.f32 %v3607_v34, %v48_v44  ;;  %v3294_v39 = vld [vmem:[#allocation2 + $0x148] sm:$0xff]   ;;  %v3295_v34 = vld [vmem:[#allocation2 + $0x140] sm:$0xff]  }
 0x5a3   :  { %3040 = vmatpush3.bf16.msra.mxu0 %v3292_v17  ;;  %v3293_v17 = vld [vmem:[#allocation2 + $0x150] sm:$0xff]  }
 0x5a4   :  { %3041 = vmatprep.subr.bf16.mxu0 %v3531_v1  ;;  %v1122_v15 = vpack.c.bf16 %v3888_v3, %v3892_v13 }
 0x5a7   :  { %3042 = vmatpush3.bf16.msra.mxu0 %v3293_v17 }
 0x5a8   :  { %3043 = vmatprep.subr.bf16.mxu0 %v3531_v1 }
 0x5ab   :  { %3044 = vmatpush3.bf16.msra.mxu0 %v3294_v39 }
 0x5ac   :  { %3045 = vmatprep.subr.bf16.mxu0 %v3531_v1 }
 0x5af   :  { %3046 = vmatpush3.bf16.msra.mxu0 %v3295_v34 }
 0x651   :  { %v815_v26 = vpop.f32.mrf.mxu0 }
 0x652   :  { %v816_v27 = vadd.f32 %v815_v26, %v765_v19 }
 0x653   :  { %v3009_v61 = vpop.f32.mrf.mxu0 }
 0x654   :  { %v822_v59 = vadd.f32 %v816_v27, %v3611_v40 }
 0x655   :  { %v818_v31 = vpop.f32.mrf.mxu0 }
 0x656   :  { %v819_v62 = vadd.f32 %v818_v31, %v765_v19  ;;  %824 = vadd.xlane.f32.xlu1 %v822_v59 }
 0x657   :  { %v3010_v0 = vpop.f32.mrf.mxu0 }
 0x658   :  { %v823_v9 = vadd.f32 %v819_v62, %v3613_v41  ;;  %v3864_v62 = vsub.s32 2, %v3617_v45 }
 0x65a   :  { %826 = vadd.xlane.f32.xlu1 %v823_v9  ;;  %v851_v16 = vrot.slane %v3622_v47, %v3864_v62 }
 0x6df   :  { %v825_v2 = vpop.xlane.xlu1 %824 }
 0x6e0   :  { %v828_v28 = vmul.f32 0.03125, %v825_v2  ;;  %v3869_v2 = vsub.s32 3, %v3617_v45 }
 0x6e2   :  { %v830_v29 = vsub.f32 %v822_v59, %v828_v28 }
 0x6e3   :  { %v827_v33 = vpop.xlane.xlu1 %826 }
 0x6e4   :  { %v829_v36 = vmul.f32 0.03125, %v827_v33  ;;  %v832_v40 = vsel %vm4268_vm2, %v830_v29, 0.0 }
 0x6e5   :  { %v834_v37 = vmul.f32 %v832_v40, %v832_v40 }
 0x6e6   :  { %v831_v21 = vsub.f32 %v823_v9, %v829_v36  ;;  %v857_v36 = vrot.slane %v3622_v47, %v3869_v2 }
 0x6e7   :  { %836 = vadd.xlane.f32.xlu1 %v834_v37 }
 0x6e8   :  { %v833_v41 = vsel %vm4268_vm2, %v831_v21, 0.0 }
 0x6e9   :  { %v835_v4 = vmul.f32 %v833_v41, %v833_v41 }
 0x6eb   :  { %838 = vadd.xlane.f32.xlu1 %v835_v4 }
 0x770   :  { %v837_v19 = vpop.xlane.xlu1 %836 }
 0x771   :  { %v840_v26 = vmul.f32 0.03125, %v837_v19  ;;  %v3902_v19 = vsub.s32 4, %v3617_v45 }
 0x773   :  { %v842_v27 = vadd.f32 1e-05, %v840_v26  ;;  %v881_v26 = vrot.slane %v3622_v47, %v3902_v19 }
 0x774   :  { %v839_v61 = vpop.xlane.xlu1 %838 }
 0x775   :  { %3372 = vrsqrt.f32 %v842_v27  ;;  %v841_v59 = vmul.f32 0.03125, %v839_v61 }
 0x777   :  { %v843_v31 = vadd.f32 1e-05, %v841_v59 }
 0x779   :  { %3374 = vrsqrt.f32 %v843_v31 }
 0x782   :  { %v3373_v0 = vpop.eup %3372 }
 0x783   :  { %v846_v9 = vmul.f32 %v3373_v0, %v832_v40 }
 0x785   :  { %v852_v33 = vmul.f32 %v851_v16, %v846_v9 }
 0x786   :  { %v3375_v28 = vpop.eup %3374 }
 0x787   :  { %v847_v29 = vmul.f32 %v3375_v28, %v833_v41  ;;  %v3873_v21 = vadd.f32 %v857_v36, %v852_v33  ;;  %v3282_v41 = vld [vmem:[#allocation2 + $0x1a8] sm:$0xff]  }
 0x788   :  { %v3906_v33 = vld [vmem:[#allocation5 + $0x8] sm:$0xff] }
 0x789   :  { %v853_v37 = vmul.f32 %v851_v16, %v847_v29 }
 0x78b   :  { %v3875_v4 = vadd.f32 %v857_v36, %v853_v37  ;;  %v1143_v36 = vrot.slane %v3906_v33, %v3620_v46 }
 0x78d   :  { %v860_v40 = vpack.c.bf16 %v3875_v4, %v3873_v21 }
 0x78f   :  { %3028 = vmatmul.mubr.bf16.vlgmr.msra.gmra.mxu1 %v860_v40 }
 0x790   :  { %3052 = vmatpush3.bf16.msra.mxu1 %v3280_v20  ;;  %3067 = vmatprep.mubr.msk.bf16.mxu1 %vm4269_vm0, %v3531_v1 }
 0x791   :  { %3053 = vmatprep.subr.bf16.mxu1 %v3531_v1 }
 0x794   :  { %3054 = vmatpush3.bf16.msra.mxu1 %v3281_v25 }
 0x795   :  { %3055 = vmatprep.subr.bf16.mxu1 %v3531_v1 }
 0x798   :  { %3056 = vmatpush3.bf16.msra.mxu1 %v3282_v41 }
 0x799   :  { %3057 = vmatprep.subr.bf16.mxu1 %v3531_v1 }
 0x79c   :  { %3058 = vmatpush3.bf16.msra.mxu1 %v3283_v56 }
 0x79d   :  { %3059 = vmatprep.subr.bf16.mxu1 %v3531_v1 }
 0x7a0   :  { %3060 = vmatpush3.bf16.msra.mxu1 %v3284_v30 }
 0x7a1   :  { %3061 = vmatprep.subr.bf16.mxu1 %v3531_v1 }
 0x7a4   :  { %3062 = vmatpush3.bf16.msra.mxu1 %v3285_v57 }
 0x7a5   :  { %3063 = vmatprep.subr.bf16.mxu1 %v3531_v1 }
 0x7a8   :  { %3064 = vmatpush3.bf16.msra.mxu1 %v3286_v38 }
 0x7a9   :  { %3065 = vmatprep.subr.bf16.mxu1 %v3531_v1 }
 0x7ac   :  { %3066 = vmatpush3.bf16.msra.mxu1 %v3287_v42 }
 0x7ad   :  { %3091 = vmatprep.subr.bf16.mxu1 %v3531_v1 }
 0x7af   :  { %3068 = vmatmul.mubr.bf16.vlgmr.msra.gmra.mxu1 %v1122_v15 }
 0x7b0   :  { %3095 = vmatprep.mubr.msk.bf16.mxu1 %vm4269_vm0, %v3531_v1 }
 0x84f   :  { %v964_v27 = vpop.f32.mrf.mxu1 }
 0x850   :  { %v965_v59 = vadd.f32 %v964_v27, %v881_v26 }
 0x851   :  { %v3029_v61 = vpop.f32.mrf.mxu1 }
 0x852   :  { %v971_v16 = vmax.f32 %v965_v59, 0.0 }
 0x853   :  { %v967_v31 = vpop.f32.mrf.mxu1 }
 0x854   :  { %v968_v0 = vadd.f32 %v967_v31, %v881_v26 }
 0x855   :  { %v3030_v9 = vpop.f32.mrf.mxu1 }
 0x856   :  { %v972_v28 = vmax.f32 %v968_v0, 0.0 }
 0x858   :  { %v973_v29 = vpack.c.bf16 %v972_v28, %v971_v16 }
 0x85a   :  { %3048 = vmatmul.mubr.bf16.vlgmr.msra.gmra.mxu0 %v973_v29  ;;  %v103_v29 = vand.u32 7, %v3617_v45 }
 0x86f   :  { %v1226_v37 = vpop.f32.mrf.mxu1 }
 0x870   :  { %v1227_v20 = vadd.f32 %v1226_v37, %v1143_v36  ;;  %v105_v37 = vand.u32 7, %v3628_v49  ;;  %v107_v49 = vand.u32 7, %v3625_v48 }
 0x871   :  { %v3069_v40 = vpop.f32.mrf.mxu1 }
 0x872   :  { %v1233_v56 = vsel %vm3659_vm4, %v1227_v20, 0.0  ;;  %v1235_v30 = vsel %vm3669_vm6, %v1227_v20, 0.0  ;;  %v1237_v57 = vsel %vm3664_vm5, %v1227_v20, 0.0  ;;  %v1239_v38 = vsel %vm3674_vm7, %v1227_v20, 0.0 }
 0x873   :  { %v1229_v25 = vpop.f32.mrf.mxu1 }
 0x874   :  { %v1230_v47 = vadd.f32 %v1229_v25, %v1143_v36  ;;  %v102_v36 = vand.u32 7, %v3594_v22  ;;  %v106_v25 = vand.u32 7, %v3640_v53 }
 0x875   :  { %v3070_v41 = vpop.f32.mrf.mxu1 }
 0x876   :  { %v3918_v44 = vpack.c.bf16 %v1230_v47, %v1227_v20  ;;  %v1234_v42 = vsel %vm3679_vm8, %v1230_v47, 0.0  ;;  %v1236_v15 = vsel %vm3689_vm10, %v1230_v47, 0.0  ;;  %v1238_v17 = vsel %vm3684_vm9, %v1230_v47, 0.0 }
 0x877   :  { %v1241_v39 = vpack.c.bf16 %v1234_v42, %v1233_v56  ;;  %v1242_v34 = vpack.c.bf16 %v1236_v15, %v1235_v30  ;;  %v1243_v26 = vpack.c.bf16 %v1238_v17, %v1237_v57  ;;  %v1240_v27 = vsel %vm3694_vm12, %v1230_v47, 0.0 }
 0x878   :  { %1247 = vrot.lane.b32.xlu1 %v3918_v44, %s3534_s0  ;;  %v1244_v61 = vpack.c.bf16 %v1240_v27, %v1239_v38  ;;  %vm111_vm2 = vcmp.le.s32.totalorder %v102_v36, %v103_v29  ;;  %v104_v20 = vand.u32 7, %v3634_v51  ;;  %vm113_vm0 = vcmp.le.s32.totalorder %v102_v36, %v105_v37 }
 0x879   :  { %3073 = vmatprep.mubr.msk.bf16.mxu0 %vm4271_vm11, %v1241_v39  ;;  %vm1339_vm1 = vmand %vm4278_vm3, %vm113_vm0  ;;  %vm114_vm15 = vcmp.le.s32.totalorder %v102_v36, %v106_v25  ;;  %v110_v57 = vand.u32 7, %v3643_v54  ;;  %vm4299_vm12 = vcmask 130048   ;;  %vm4301_vm0 = vcmp.eq.s32.totalorder %v3734_v43, %v3646_v55 }
 0x87a   :  { %vm112_vm14 = vcmp.le.s32.totalorder %v102_v36, %v104_v20  ;;  %vm1340_vm3 = vmand %vm4301_vm0, %vm114_vm15  ;;  %v108_v54 = vand.u32 7, %v3637_v52  ;;  %v109_v52 = vand.u32 7, %v3631_v50 }
 0x87b   :  { %vm118_vm7 = vcmp.le.s32.totalorder %v102_v36, %v110_v57  ;;  %vm4302_vm9 = vmmov %vm4299_vm12 }
 0x87c   :  { %vm4305_vm0 = vmmov %vm4302_vm9 }
 0x8ea   :  { %v1248_v59 = vpop.permute.xlu1 %1247 }
 0x8eb   :  { %v1262_v31 = vsel %vm4271_vm11, %v1248_v59, 0  ;;  %3231 = vmatprep.subr.msk.bf16.mxu0 %vm4271_vm11, %v1248_v59 }
 0x8ec   :  { %3072 = vmatpush3.bf16.xpose.msra.mxu0 %v1262_v31 }
 0x8f3   :  { %3074 = vmatmul.mubr.msk.bf16.vlgmr.msra.gmra.mxu0 %vm4271_vm11, %v1242_v34 }
 0x8f4   :  { %3077 = vmatprep.mubr.msk.bf16.mxu0 %vm4271_vm11, %v1243_v26 }
 0x8fb   :  { %3078 = vmatmul.mubr.msk.bf16.gmra.mxu0 %vm4271_vm11, %v1244_v61  ;;  %vm1337_vm11 = vmand %vm4277_vm13, %vm111_vm2  ;;  %vm4300_vm2 = vcmp.eq.s32.totalorder %v3739_v58, %v3646_v55 }
 0x8fc   :  { %vm1338_vm13 = vmand %vm4300_vm2, %vm112_vm14  ;;  %vm4303_vm14 = vcmp.eq.s32.totalorder %v3765_v24, %v3646_v55  ;;  %vm116_vm2 = vcmp.le.s32.totalorder %v102_v36, %v108_v54 }
 0x91a   :  { %v3936_v0 = vpop.f32.mrf.mxu0 }
 0x91c   :  { %v3049_v9 = vpop.f32.mrf.mxu0 }
 0x91e   :  { %v3938_v16 = vpop.f32.mrf.mxu0 }
 0x920   :  { %v3050_v28 = vpop.f32.mrf.mxu0 }
 0x9b3   :  { %v3075_v40 = vpop.f32.mrf.mxu0 }
 0x9b4   :  { %v1331_v41 = vmul.f32 0.35355338, %v3075_v40 }
 0x9b5   :  { %v1298_v47 = vpop.f32.mrf.mxu0 }
 0x9b6   :  { %v1329_v56 = vmul.f32 0.35355338, %v1298_v47  ;;  %v1347_v17 = vsel %vm1339_vm1, %v1331_v41, -1e+30 }
 0x9b7   :  { %v3076_v30 = vpop.f32.mrf.mxu0  ;;  %v1359_v26 = vsel %vm4299_vm12, %v1347_v17, -inf }
 0x9b8   :  { %v1345_v51 = vsel %vm1337_vm11, %v1329_v56, -1e+30  ;;  %v1332_v42 = vmul.f32 0.35355338, %v3076_v30  ;;  %vm115_vm11 = vcmp.le.s32.totalorder %v102_v36, %v107_v49 }
 0x9b9   :  { %v1301_v53 = vpop.f32.mrf.mxu0  ;;  %v1353_v38 = vsel %vm4299_vm12, %v1345_v51, -inf  ;;  %vm1341_vm1 = vmand %vm4303_vm14, %vm115_vm11  ;;  %vm117_vm12 = vcmp.le.s32.totalorder %v102_v36, %v109_v52  ;;  %vm4309_vm14 = vcmp.eq.s32.totalorder %v3782_v32, %v3646_v55 }
 0x9ba   :  { %v1330_v15 = vmul.f32 0.35355338, %v1301_v53  ;;  %1354 = vmax.xlane.f32.xlu0 %v1353_v38  ;;  %v1348_v59 = vsel %vm1340_vm3, %v1332_v42, -1e+30  ;;  %vm4307_vm3 = vcmp.eq.s32.totalorder %v3745_v63, %v3646_v55 }
 0x9bb   :  { %v3079_v39 = vpop.f32.mrf.mxu0  ;;  %v1362_v29 = vsel %vm4305_vm0, %v1348_v59, -inf  ;;  %vm1342_vm11 = vmand %vm4307_vm3, %vm116_vm2 }
 0x9bc   :  { %v1346_v48 = vsel %vm1338_vm13, %v1330_v15, -1e+30  ;;  %vm4304_vm13 = vcmp.eq.s32.totalorder %v3763_v23, %v3646_v55  ;;  %v1335_v41 = vmul.f32 0.35355338, %v3079_v39  ;;  %vm4312_vm2 = vmmov %vm4305_vm0 }
 0x9bd   :  { %v1314_v34 = vpop.f32.mrf.mxu0  ;;  %v1356_v27 = vsel %vm4302_vm9, %v1346_v48, -inf  ;;  %vm1344_vm15 = vmand %vm4304_vm13, %vm118_vm7 }
 0x9be   :  { %v1333_v61 = vmul.f32 0.35355338, %v1314_v34  ;;  %1360 = vmax.xlane.f32.xlu0 %v1359_v26  ;;  %1357 = vmax.xlane.f32.xlu1 %v1356_v27  ;;  %vm4306_vm9 = vmmov %vm4305_vm0 }
 0x9bf   :  { %v3080_v31 = vpop.f32.mrf.mxu0  ;;  %vm4308_vm7 = vmmov %vm4305_vm0 }
 0x9c0   :  { %v1336_v9 = vmul.f32 0.35355338, %v3080_v31  ;;  %v1349_v40 = vsel %vm1341_vm1, %v1333_v61, -1e+30  ;;  %vm1343_vm13 = vmand %vm4309_vm14, %vm117_vm12 }
 0x9c1   :  { %v1317_v28 = vpop.f32.mrf.mxu0  ;;  %v1365_v47 = vsel %vm4308_vm7, %v1349_v40, -inf  ;;  %v1351_v30 = vsel %vm1343_vm13, %v1335_v41, -1e+30  ;;  %vm4310_vm1 = vmmov %vm4305_vm0 }
 0x9c2   :  { %v1334_v37 = vmul.f32 0.35355338, %v1317_v28  ;;  %1363 = vmax.xlane.f32.xlu0 %v1362_v29  ;;  %v1352_v20 = vsel %vm1344_vm15, %v1336_v9, -1e+30  ;;  %v1371_v49 = vsel %vm4310_vm1, %v1351_v30, -inf  ;;  %vm4311_vm15 = vmmov %vm4305_vm0 }
 0x9c3   :  { %v1374_v25 = vsel %vm4306_vm9, %v1352_v20, -inf  ;;  %vm4313_vm9 = vmmov %vm4305_vm0 }
 0x9c4   :  { %1375 = vmax.xlane.f32.xlu1 %v1374_v25  ;;  %v1350_v50 = vsel %vm1342_vm11, %v1334_v37, -1e+30  ;;  %vm4314_vm3 = vmmov %vm4305_vm0 }
 0x9c5   :  { %v1368_v56 = vsel %vm4305_vm0, %v1350_v50, -inf  ;;  %vm4315_vm11 = vmmov %vm4305_vm0 }
 0x9c6   :  { %1366 = vmax.xlane.f32.xlu0 %v1365_v47  ;;  %vm4316_vm12 = vmmov %vm4305_vm0 }
 0x9c7   :  { %vm4317_vm7 = vmmov %vm4305_vm0 }
 0x9c8   :  { %vm4318_vm14 = vmmov %vm4305_vm0 }
 0x9c9   :  { %vm4319_vm13 = vmmov %vm4305_vm0 }
 0x9ca   :  { %1369 = vmax.xlane.f32.xlu0 %v1368_v56  ;;  %vm4320_vm1 = vmmov %vm4305_vm0 }
 0x9ce   :  { %1372 = vmax.xlane.f32.xlu0 %v1371_v49 }
 0xa43   :  { %v1355_v57 = vpop.xlane.xlu0 %1354 }
 0xa44   :  { %v1377_v53 = vsub.f32 %v1345_v51, %v1355_v57 }
 0xa46   :  { %v1385_v39 = vmul.f32 1.442695, %v1377_v53  ;;  %v3989_v53 = vsub.s32 5, %v3617_v45 }
 0xa47   :  { %v1361_v38 = vpop.xlane.xlu0 %1360  ;;  %v1358_v36 = vpop.xlane.xlu1 %1357 }
 0xa48   :  { %v1379_v42 = vsub.f32 %v1347_v17, %v1361_v38  ;;  %v1378_v15 = vsub.f32 %v1346_v48, %v1358_v36  ;;  %v3991_v36 = vld [vmem:[#allocation5] sm:$0xff] }
 0xa4a   :  { %v1389_v54 = vmul.f32 1.442695, %v1379_v42  ;;  %v1387_v34 = vmul.f32 1.442695, %v1378_v15  ;;  %v994_v42 = vrot.slane %v3991_v36, %v3989_v53 }
 0xa4b   :  { %v1364_v26 = vpop.xlane.xlu0 %1363 }
 0xa4c   :  { %3376 = vpow2.f32 %v1389_v54  ;;  %v1380_v27 = vsub.f32 %v1348_v59, %v1364_v26 }
 0xa4d   :  { %3378 = vpow2.f32 %v1387_v34  ;;  %v1376_v31 = vpop.xlane.xlu1 %1375  ;;  %v1078_v34 = vadd.f32 %v3936_v0, %v994_v42 }
 0xa4e   :  { %3380 = vpow2.f32 %v1385_v39  ;;  %v1391_v61 = vmul.f32 1.442695, %v1380_v27  ;;  %v1384_v52 = vsub.f32 %v1352_v20, %v1376_v31  ;;  %v1081_v31 = vadd.f32 %v3938_v16, %v994_v42 }
 0xa4f   :  { %v1367_v9 = vpop.xlane.xlu0 %1366 }
 0xa50   :  { %3382 = vpow2.f32 %v1391_v61  ;;  %v1399_v51 = vmul.f32 1.442695, %v1384_v52  ;;  %v1381_v37 = vsub.f32 %v1349_v40, %v1367_v9  ;;  %v4001_v9 = vadd.f32 %v1078_v34, %v3873_v21 }
 0xa52   :  { %v1393_v59 = vmul.f32 1.442695, %v1381_v37 }
 0xa53   :  { %v1370_v28 = vpop.xlane.xlu0 %1369 }
 0xa54   :  { %v1382_v29 = vsub.f32 %v1350_v50, %v1370_v28  ;;  %v4006_v28 = vadd.f32 %v1081_v31, %v3875_v4 }
 0xa56   :  { %v1395_v25 = vmul.f32 1.442695, %v1382_v29 }
 0xa57   :  { %v1373_v17 = vpop.xlane.xlu0 %1372 }
 0xa58   :  { %3384 = vpow2.f32 %v1395_v25  ;;  %v1383_v48 = vsub.f32 %v1351_v30, %v1373_v17 }
 0xa59   :  { %v3981_v47 = vpop.eup %3376  ;;  %3386 = vpow2.f32 %v1399_v51 }
 0xa5a   :  { %v3379_v41 = vpop.eup %3378  ;;  %v1397_v56 = vmul.f32 1.442695, %v1383_v48  ;;  %v1407_v49 = vsel %vm4311_vm15, %v3981_v47, 0.0  ;;  %vm4321_vm15 = vmmov %vm4305_vm0 }
 0xa5b   :  { %v3381_v57 = vpop.eup %3380  ;;  %v1404_v20 = vsel %vm4312_vm2, %v3379_v41, 0.0  ;;  %1408 = vadd.xlane.f32.xlu0 %v1407_v49  ;;  %vm4322_vm2 = vmmov 0  }
 0xa5c   :  { %3388 = vpow2.f32 %v1397_v56  ;;  %1405 = vadd.xlane.f32.xlu1 %v1404_v20  ;;  %v1401_v30 = vsel %vm4314_vm3, %v3381_v57, 0.0  ;;  %vm4324_vm3 = vnez %v4290_v8 }
 0xa5d   :  { %v3383_v40 = vpop.eup %3382  ;;  %3390 = vpow2.f32 %v1393_v59 }
 0xa5e   :  { %v1410_v50 = vsel %vm4313_vm9, %v3383_v40, 0.0  ;;  %vm4323_vm9 = vnez %v4294_v11 }
 0xa5f   :  { %1402 = vadd.xlane.f32.xlu0 %v1401_v30 }
 0xa60   :  { %1411 = vadd.xlane.f32.xlu1 %v1410_v50 }
 0xa65   :  { %v3385_v38 = vpop.eup %3384 }
 0xa66   :  { %v1416_v15 = vsel %vm4315_vm11, %v3385_v38, 0.0  ;;  %v3387_v39 = vpop.eup %3386  ;;  %vm4325_vm11 = vnez %v4298_v14 }
 0xa67   :  { %1417 = vadd.xlane.f32.xlu1 %v1416_v15  ;;  %v1422_v26 = vsel %vm4316_vm12, %v3387_v39, 0.0  ;;  %vm4326_vm12 = vcmask 261120  }
 0xa69   :  { %v3389_v54 = vpop.eup %3388 }
 0xa6a   :  { %v1419_v27 = vsel %vm4317_vm7, %v3389_v54, 0.0  ;;  %v3391_v61 = vpop.eup %3390  ;;  %vm4327_vm7 = vcmp.lt.s32.totalorder %v3594_v22, 32 }
 0xa6b   :  { %1423 = vadd.xlane.f32.xlu1 %v1422_v26  ;;  %1420 = vadd.xlane.f32.xlu0 %v1419_v27  ;;  %v1413_v52 = vsel %vm4318_vm14, %v3391_v61, 0.0  ;;  %vm4328_vm14 = vmmov %vm4327_vm7 }
 0xa6f   :  { %1086 = vadd.xlane.f32.xlu1 %v4001_v9  ;;  %1414 = vadd.xlane.f32.xlu0 %v1413_v52 }
 0xa73   :  { %1088 = vadd.xlane.f32.xlu1 %v4006_v28 }
 0xa85   :  { %1445 = vrot.lane.b32.xlu0 %v3918_v44, %s3525_s15 }
 0xae4   :  { %v1409_v0 = vpop.xlane.xlu0 %1408 }
 0xae5   :  { %v1406_v29 = vpop.xlane.xlu1 %1405 }
 0xae6   :  { %3392 = vrcp.f32 %v1406_v29 }
 0xae8   :  { %v1403_v16 = vpop.xlane.xlu0 %1402 }
 0xae9   :  { %v1412_v51 = vpop.xlane.xlu1 %1411  ;;  %3394 = vrcp.f32 %v1403_v16  ;;  %v3297_v16 = vld [vmem:[#allocation2 + $0x1c0] sm:$0xff]  }
 0xaea   :  { %3396 = vrcp.f32 %v1412_v51 }
 0xaeb   :  { %3398 = vrcp.f32 %v1409_v0 }
 0xaf0   :  { %v1418_v21 = vpop.xlane.xlu1 %1417 }
 0xaf3   :  { %v3393_v37 = vpop.eup %3392 }
 0xaf4   :  { %v1424_v25 = vpop.xlane.xlu1 %1423  ;;  %v1421_v17 = vpop.xlane.xlu0 %1420  ;;  %v1434_v59 = vmul.f32 %v3393_v37, %v3379_v41 }
 0xaf5   :  { %3400 = vrcp.f32 %v1424_v25 }
 0xaf6   :  { %v3395_v4 = vpop.eup %3394  ;;  %3402 = vrcp.f32 %v1421_v17 }
 0xaf7   :  { %3404 = vrcp.f32 %v1418_v21  ;;  %v1433_v48 = vmul.f32 %v3395_v4, %v3381_v57  ;;  %v3397_v56 = vpop.eup %3396 }
 0xaf8   :  { %v1415_v44 = vpop.xlane.xlu0 %1414  ;;  %v3399_v20 = vpop.eup %3398  ;;  %v1436_v50 = vmul.f32 %v3397_v56, %v3383_v40 }
 0xaf9   :  { %3406 = vrcp.f32 %v1415_v44  ;;  %v1441_v49 = vpack.c.bf16 %v1434_v59, %v1433_v48  ;;  %v1435_v42 = vmul.f32 %v3399_v20, %v3981_v47  ;;  %v3296_v47 = vld [vmem:[#allocation2 + $0x1c8] sm:$0xff]  }
 0xafa   :  { %3092 = vmatpush3.bf16.msra.mxu1 %v3296_v47 }
 0xafb   :  { %3083 = vmatprep.mubr.msk.bf16.mxu0 %vm4319_vm13, %v1441_v49  ;;  %v1442_v15 = vpack.c.bf16 %v1436_v50, %v1435_v42  ;;  %3093 = vmatprep.subr.bf16.mxu1 %v3531_v1  ;;  %vm4329_vm13 = vmmov %vm4327_vm7 }
 0xafc   :  { %v1446_v30 = vpop.permute.xlu0 %1445 }
 0xafd   :  { %3081 = vmatprep.subr.bf16.mxu0 %v1446_v30 }
 0xafe   :  { %3082 = vmatpush3.bf16.msra.mxu0 %v1446_v30  ;;  %3094 = vmatpush3.bf16.msra.mxu1 %v3297_v16 }
 0xaff   :  { %3099 = vmatprep.subr.bf16.mxu0 %v3531_v1  ;;  %3119 = vmatprep.subr.bf16.mxu1 %v3531_v1 }
 0xb01   :  { %3084 = vmatmul.mubr.msk.bf16.vlgmr.msra.gmra.mxu0 %vm4305_vm0, %v1442_v15  ;;  %vm4330_vm0 = vmmov %vm4327_vm7 }
 0xb02   :  { %v3401_v57 = vpop.eup %3400 }
 0xb03   :  { %v3403_v41 = vpop.eup %3402  ;;  %v1440_v31 = vmul.f32 %v3401_v57, %v3387_v39 }
 0xb04   :  { %v3405_v34 = vpop.eup %3404  ;;  %v1439_v27 = vmul.f32 %v3403_v41, %v3389_v54 }
 0xb05   :  { %v1438_v40 = vmul.f32 %v3405_v34, %v3385_v38 }
 0xb06   :  { %v3407_v26 = vpop.eup %3406  ;;  %v1444_v29 = vpack.c.bf16 %v1440_v31, %v1439_v27  ;;  %v1548_v27 = vrot.slane %v3906_v33, %v3839_v18 }
 0xb07   :  { %v1437_v52 = vmul.f32 %v3407_v26, %v3391_v61  ;;  %v1087_v26 = vpop.xlane.xlu1 %1086 }
 0xb08   :  { %v1090_v31 = vmul.f32 0.03125, %v1087_v26 }
 0xb09   :  { %v1443_v0 = vpack.c.bf16 %v1438_v40, %v1437_v52 }
 0xb0a   :  { %v1092_v16 = vsub.f32 %v4001_v9, %v1090_v31  ;;  %v3298_v9 = vld [vmem:[#allocation2 + $0x278] sm:$0xff]  }
 0xb0b   :  { %3087 = vmatprep.mubr.msk.bf16.mxu0 %vm4320_vm1, %v1443_v0  ;;  %v1089_v40 = vpop.xlane.xlu1 %1088  ;;  %vm4331_vm1 = vmmov %vm4326_vm12 }
 0xb0c   :  { %3088 = vmatmul.mubr.msk.bf16.gmra.mxu0 %vm4321_vm15, %v1444_v29  ;;  %vm4332_vm15 = vmmov %vm4331_vm1 }
 0xb0d   :  { %3115 = vmatprep.mubr.msk.bf16.mxu0 %vm4322_vm2, %v3531_v1 }
 0xbc1   :  { %v3085_v39 = vpop.f32.mrf.mxu0 }
 0xbc2   :  { %v1527_v25 = vsel %vm3669_vm6, %v3085_v39, 0.0  ;;  %v1091_v39 = vmul.f32 0.03125, %v1089_v40 }
 0xbc3   :  { %v1494_v54 = vpop.f32.mrf.mxu0 }
 0xbc4   :  { %v1525_v21 = vsel %vm3659_vm4, %v1494_v54, 0.0 }
 0xbc5   :  { %v3086_v38 = vpop.f32.mrf.mxu0  ;;  %v1533_v48 = vadd.f32 %v1527_v25, %v1525_v21  ;;  %v1093_v21 = vsub.f32 %v4006_v28, %v1091_v39  ;;  %v3300_v28 = vld [vmem:[#allocation2 + $0x268] sm:$0xff]   ;;  %v1112_v39 = vsub.s32 6, %v3617_v45 }
 0xbc6   :  { %v1528_v56 = vsel %vm3689_vm10, %v3086_v38, 0.0 }
 0xbc7   :  { %v1497_v61 = vpop.f32.mrf.mxu0  ;;  %v2170_v11 = vrot.slane %v4198_v12, %v1112_v39 }
 0xbc8   :  { %v1526_v17 = vsel %vm3679_vm8, %v1497_v61, 0.0 }
 0xbc9   :  { %v1534_v44 = vadd.f32 %v1528_v56, %v1526_v17  ;;  %v4050_v17 = vsel %vm4328_vm14, %v1093_v21, 0.0  ;;  %v3304_v56 = vld [vmem:[#allocation2 + $0x248] sm:$0xff]   ;;  %v1118_v21 = vsub.s32 7, %v3617_v45  ;;  %vm4335_vm14 = vmmov %vm4331_vm1  ;;  %v3329_v45 = vld [vmem:[#allocation2 + $0x310] sm:$0xff]  }
 0xbcc   :  { %v3089_v51 = vpop.f32.mrf.mxu0 }
 0xbcd   :  { %v1531_v42 = vsel %vm4324_vm3, %v3089_v51, 0.0 }
 0xbce   :  { %v1510_v37 = vpop.f32.mrf.mxu0 }
 0xbcf   :  { %v1529_v4 = vsel %vm3664_vm5, %v1510_v37, 0.0  ;;  %v1094_v37 = vsel %vm4327_vm7, %v1092_v16, 0.0  ;;  %v3307_v16 = vld [vmem:[#allocation2 + $0x230] sm:$0xff]   ;;  %vm4334_vm7 = vmmov %vm4331_vm1 }
 0xbd0   :  { %v3090_v59 = vpop.f32.mrf.mxu0  ;;  %v1535_v49 = vadd.f32 %v1533_v48, %v1529_v4  ;;  %v1096_v25 = vmul.f32 %v1094_v37, %v1094_v37  ;;  %v3301_v4 = vld [vmem:[#allocation2 + $0x260] sm:$0xff]   ;;  %v3302_v48 = vld [vmem:[#allocation2 + $0x258] sm:$0xff]  }
 0xbd1   :  { %v1532_v15 = vsel %vm4325_vm11, %v3090_v59, 0.0  ;;  %v3303_v59 = vld [vmem:[#allocation2 + $0x250] sm:$0xff]  }
 0xbd2   :  { %v1513_v20 = vpop.f32.mrf.mxu0  ;;  %v1537_v57 = vadd.f32 %v1535_v49, %v1531_v42  ;;  %v3306_v49 = vld [vmem:[#allocation2 + $0x238] sm:$0xff]  }
 0xbd3   :  { %v1530_v50 = vsel %vm4323_vm9, %v1513_v20, 0.0  ;;  %3100 = vmatpush3.bf16.msra.mxu0 %v3306_v49  ;;  %v3313_v49 = vld [vmem:[#allocation2 + $0x200] sm:$0xff]  }
 0xbd4   :  { %v1536_v30 = vadd.f32 %v1534_v44, %v1530_v50  ;;  %v3305_v44 = vld [vmem:[#allocation2 + $0x240] sm:$0xff]   ;;  %3101 = vmatprep.subr.bf16.mxu0 %v3531_v1 }
 0xbd6   :  { %v1538_v41 = vadd.f32 %v1536_v30, %v1532_v15 }
 0xbd7   :  { %3102 = vmatpush3.bf16.msra.mxu0 %v3307_v16 }
 0xbd8   :  { %v1539_v34 = vpack.c.bf16 %v1538_v41, %v1537_v57  ;;  %3103 = vmatprep.subr.bf16.mxu0 %v3531_v1 }
 0xbda   :  { %3096 = vmatmul.mubr.msk.bf16.vlgmr.msra.gmra.mxu1 %vm4326_vm12, %v1539_v34  ;;  %vm4333_vm12 = vmmov %vm4331_vm1 }
 0xbdb   :  { %3135 = vmatprep.mubr.msk.bf16.mxu1 %vm4322_vm2, %v3531_v1  ;;  %3120 = vmatpush3.bf16.msra.mxu1 %v3298_v9 }
 0xbdc   :  { %3121 = vmatprep.subr.bf16.mxu1 %v3531_v1 }
 0xc9a   :  { %v1598_v52 = vpop.f32.mrf.mxu1 }
 0xc9b   :  { %v1599_v0 = vadd.f32 %v1598_v52, %v1548_v27 }
 0xc9c   :  { %v3097_v29 = vpop.f32.mrf.mxu1 }
 0xc9d   :  { %v1605_v47 = vadd.f32 %v1599_v0, %v3892_v13  ;;  %v1097_v13 = vmul.f32 %v4050_v17, %v4050_v17 }
 0xc9e   :  { %v1601_v54 = vpop.f32.mrf.mxu1 }
 0xc9f   :  { %v1602_v38 = vadd.f32 %v1601_v54, %v1548_v27  ;;  %1607 = vadd.xlane.f32.xlu1 %v1605_v47  ;;  %v3308_v54 = vld [vmem:[#allocation2 + $0x228] sm:$0xff]  }
 0xca0   :  { %v3098_v61 = vpop.f32.mrf.mxu1  ;;  %3104 = vmatpush3.bf16.msra.mxu0 %v3308_v54 }
 0xca1   :  { %v1606_v51 = vadd.f32 %v1602_v38, %v3888_v3  ;;  %v3299_v3 = vld [vmem:[#allocation2 + $0x270] sm:$0xff]   ;;  %3105 = vmatprep.subr.bf16.mxu0 %v3531_v1 }
 0xca2   :  { %3122 = vmatpush3.bf16.msra.mxu1 %v3299_v3 }
 0xca3   :  { %1609 = vadd.xlane.f32.xlu1 %v1606_v51  ;;  %3123 = vmatprep.subr.bf16.mxu1 %v3531_v1 }
 0xca6   :  { %3124 = vmatpush3.bf16.msra.mxu1 %v3300_v28  ;;  %v1119_v28 = vrot.slane %v3991_v36, %v1118_v21 }
 0xca7   :  { %1098 = vadd.xlane.f32.xlu1 %v1096_v25  ;;  %3125 = vmatprep.subr.bf16.mxu1 %v3531_v1  ;;  %v3309_v25 = vld [vmem:[#allocation2 + $0x220] sm:$0xff]  }
 0xca8   :  { %3106 = vmatpush3.bf16.msra.mxu0 %v3309_v25 }
 0xca9   :  { %3107 = vmatprep.subr.bf16.mxu0 %v3531_v1 }
 0xcaa   :  { %3126 = vmatpush3.bf16.msra.mxu1 %v3301_v4 }
 0xcab   :  { %1100 = vadd.xlane.f32.xlu1 %v1097_v13  ;;  %3127 = vmatprep.subr.bf16.mxu1 %v3531_v1 }
 0xcae   :  { %3128 = vmatpush3.bf16.msra.mxu1 %v3302_v48 }
 0xcaf   :  { %3129 = vmatprep.subr.bf16.mxu1 %v3531_v1 }
 0xcb2   :  { %3130 = vmatpush3.bf16.msra.mxu1 %v3303_v59 }
 0xcb3   :  { %3131 = vmatprep.subr.bf16.mxu1 %v3531_v1 }
 0xcb6   :  { %3132 = vmatpush3.bf16.msra.mxu1 %v3304_v56  ;;  %v3311_v56 = vld [vmem:[#allocation2 + $0x210] sm:$0xff]  }
 0xcb7   :  { %3133 = vmatprep.subr.bf16.mxu1 %v3531_v1 }
 0xcba   :  { %3134 = vmatpush3.bf16.msra.mxu1 %v3305_v44 }
 0xd28   :  { %v1608_v20 = vpop.xlane.xlu1 %1607 }
 0xd29   :  { %v1611_v50 = vmul.f32 0.03125, %v1608_v20 }
 0xd2b   :  { %v1613_v30 = vsub.f32 %v1605_v47, %v1611_v50 }
 0xd2c   :  { %v1610_v42 = vpop.xlane.xlu1 %1609 }
 0xd2d   :  { %v1612_v15 = vmul.f32 0.03125, %v1610_v42  ;;  %v1615_v57 = vsel %vm4329_vm13, %v1613_v30, 0.0  ;;  %vm4336_vm13 = vmmov %vm4331_vm1 }
 0xd2e   :  { %v1617_v41 = vmul.f32 %v1615_v57, %v1615_v57 }
 0xd2f   :  { %v1614_v34 = vsub.f32 %v1606_v51, %v1612_v15  ;;  %v1113_v51 = vrot.slane %v3991_v36, %v1112_v39 }
 0xd30   :  { %1619 = vadd.xlane.f32.xlu0 %v1617_v41  ;;  %v1099_v26 = vpop.xlane.xlu1 %1098 }
 0xd31   :  { %v1102_v27 = vmul.f32 0.03125, %v1099_v26  ;;  %v1616_v31 = vsel %vm4330_vm0, %v1614_v34, 0.0  ;;  %v1634_v26 = vrot.slane %v3906_v33, %v3864_v62  ;;  %vm4337_vm0 = vcmp.eq.s32.totalorder %v3741_v60, %v3646_v55 }
 0xd32   :  { %v1618_v52 = vmul.f32 %v1616_v31, %v1616_v31 }
 0xd33   :  { %v1104_v40 = vadd.f32 1e-05, %v1102_v27 }
 0xd34   :  { %1621 = vadd.xlane.f32.xlu1 %v1618_v52  ;;  %v1101_v0 = vpop.xlane.xlu1 %1100 }
 0xd35   :  { %3408 = vrsqrt.f32 %v1104_v40  ;;  %v1103_v29 = vmul.f32 0.03125, %v1101_v0  ;;  %v1640_v0 = vrot.slane %v3906_v33, %v3869_v2 }
 0xd37   :  { %v1105_v47 = vadd.f32 1e-05, %v1103_v29 }
 0xd39   :  { %3410 = vrsqrt.f32 %v1105_v47 }
 0xd42   :  { %v3409_v38 = vpop.eup %3408 }
 0xd43   :  { %v1108_v61 = vmul.f32 %v3409_v38, %v1094_v37  ;;  %v3310_v37 = vld [vmem:[#allocation2 + $0x218] sm:$0xff]  }
 0xd44   :  { %3108 = vmatpush3.bf16.msra.mxu0 %v3310_v37 }
 0xd45   :  { %v1114_v3 = vmul.f32 %v1113_v51, %v1108_v61  ;;  %3109 = vmatprep.subr.bf16.mxu0 %v3531_v1 }
 0xd46   :  { %v3411_v13 = vpop.eup %3410 }
 0xd47   :  { %v1109_v9 = vmul.f32 %v3411_v13, %v4050_v17  ;;  %v1120_v48 = vadd.f32 %v1119_v28, %v1114_v3  ;;  %v3312_v17 = vld [vmem:[#allocation2 + $0x208] sm:$0xff]  }
 0xd48   :  { %3110 = vmatpush3.bf16.msra.mxu0 %v3311_v56 }
 0xd49   :  { %v1115_v4 = vmul.f32 %v1113_v51, %v1109_v9  ;;  %3111 = vmatprep.subr.bf16.mxu0 %v3531_v1 }
 0xd4b   :  { %v1121_v59 = vadd.f32 %v1119_v28, %v1115_v4  ;;  %v1664_v28 = vrot.slane %v3906_v33, %v3902_v19 }
 0xd4c   :  { %3112 = vmatpush3.bf16.msra.mxu0 %v3312_v17 }
 0xd4d   :  { %v1754_v44 = vpack.c.bf16 %v1121_v59, %v1120_v48  ;;  %3113 = vmatprep.subr.bf16.mxu0 %v3531_v1 }
 0xd4f   :  { %3136 = vmatmul.mubr.bf16.vlgmr.msra.gmra.mxu1 %v1754_v44 }
 0xd50   :  { %3114 = vmatpush3.bf16.msra.mxu0 %v3313_v49 }
 0xdb9   :  { %v1620_v36 = vpop.xlane.xlu0 %1619 }
 0xdba   :  { %v1623_v20 = vmul.f32 0.03125, %v1620_v36 }
 0xdbc   :  { %v1625_v50 = vadd.f32 1e-05, %v1623_v20 }
 0xdbd   :  { %v1622_v30 = vpop.xlane.xlu1 %1621 }
 0xdbe   :  { %3412 = vrsqrt.f32 %v1625_v50  ;;  %v1624_v42 = vmul.f32 0.03125, %v1622_v30 }
 0xdc0   :  { %v1626_v15 = vadd.f32 1e-05, %v1624_v42 }
 0xdc2   :  { %3414 = vrsqrt.f32 %v1626_v15 }
 0xdcb   :  { %v3413_v41 = vpop.eup %3412 }
 0xdcc   :  { %v1629_v34 = vmul.f32 %v3413_v41, %v1615_v57  ;;  %v1775_v57 = vrot.slane %v3906_v33, %v3989_v53 }
 0xdce   :  { %v1635_v40 = vmul.f32 %v1634_v26, %v1629_v34 }
 0xdcf   :  { %v3415_v27 = vpop.eup %3414 }
 0xdd0   :  { %v1630_v52 = vmul.f32 %v3415_v27, %v1616_v31  ;;  %v4085_v47 = vadd.f32 %v1640_v0, %v1635_v40 }
 0xdd2   :  { %v1636_v29 = vmul.f32 %v1634_v26, %v1630_v52 }
 0xdd4   :  { %v4087_v16 = vadd.f32 %v1640_v0, %v1636_v29 }
 0xdd6   :  { %v1643_v54 = vpack.c.bf16 %v4087_v16, %v4085_v47 }
 0xdd8   :  { %3116 = vmatmul.mubr.bf16.vlgmr.msra.gmra.mxu0 %v1643_v54 }
 0xe0f   :  { %v1858_v38 = vpop.f32.mrf.mxu1 }
 0xe10   :  { %v1859_v31 = vadd.f32 %v1858_v38, %v1775_v57 }
 0xe11   :  { %v3137_v61 = vpop.f32.mrf.mxu1 }
 0xe13   :  { %v1861_v51 = vpop.f32.mrf.mxu1 }
 0xe14   :  { %v1862_v25 = vadd.f32 %v1861_v51, %v1775_v57 }
 0xe15   :  { %v3138_v13 = vpop.f32.mrf.mxu1 }
 0xe16   :  { %v4093_v9 = vpack.c.bf16 %v1862_v25, %v1859_v31 }
 0xe18   :  { %3232 = vmatprep.subr.msk.bf16.mxu0 %vm4331_vm1, %v4093_v9  ;;  %v1891_v3 = vsel %vm4332_vm15, %v4093_v9, 0  ;;  %vm4338_vm1 = vcmask 130048   ;;  %vm4339_vm15 = vcmp.eq.s32.totalorder %v3730_v35, %v3646_v55 }
 0xe19   :  { %3140 = vmatpush3.bf16.xpose.msra.mxu0 %v1891_v3 }
 0xe1a   :  { %3159 = vmatprep.subr.bf16.mxu0 %v3531_v1 }
 0xe98   :  { %v1747_v37 = vpop.f32.mrf.mxu0 }
 0xe99   :  { %v1748_v4 = vadd.f32 %v1747_v37, %v1664_v28 }
 0xe9a   :  { %v3117_v48 = vpop.f32.mrf.mxu0 }
 0xe9b   :  { %v1867_v44 = vsel %vm3669_vm6, %v1748_v4, 0.0  ;;  %v1865_v36 = vsel %vm3659_vm4, %v1748_v4, 0.0  ;;  %v1869_v42 = vsel %vm3664_vm5, %v1748_v4, 0.0  ;;  %v1871_v34 = vsel %vm4324_vm3, %v1748_v4, 0.0 }
 0xe9c   :  { %v1750_v59 = vpop.f32.mrf.mxu0 }
 0xe9d   :  { %v1751_v56 = vadd.f32 %v1750_v59, %v1664_v28 }
 0xe9e   :  { %v3118_v17 = vpop.f32.mrf.mxu0 }
 0xe9f   :  { %v1868_v49 = vsel %vm3689_vm10, %v1751_v56, 0.0  ;;  %v1866_v20 = vsel %vm3679_vm8, %v1751_v56, 0.0  ;;  %v1870_v33 = vsel %vm4323_vm9, %v1751_v56, 0.0  ;;  %v1872_v41 = vsel %vm4325_vm11, %v1751_v56, 0.0 }
 0xea0   :  { %v1874_v50 = vpack.c.bf16 %v1868_v49, %v1867_v44  ;;  %v1873_v30 = vpack.c.bf16 %v1866_v20, %v1865_v36  ;;  %v1875_v15 = vpack.c.bf16 %v1870_v33, %v1869_v42  ;;  %v1876_v26 = vpack.c.bf16 %v1872_v41, %v1871_v34 }
 0xea2   :  { %3141 = vmatprep.mubr.msk.bf16.mxu0 %vm4333_vm12, %v1873_v30  ;;  %vm4340_vm12 = vmmov %vm4338_vm1 }
 0xea3   :  { %3142 = vmatmul.mubr.msk.bf16.vlgmr.msra.gmra.mxu0 %vm4334_vm7, %v1874_v50  ;;  %vm4341_vm7 = vcmp.eq.s32.totalorder %v3734_v43, %v3646_v55 }
 0xea4   :  { %3145 = vmatprep.mubr.msk.bf16.mxu0 %vm4335_vm14, %v1875_v15  ;;  %vm4342_vm14 = vcmp.eq.s32.totalorder %v3782_v32, %v3646_v55 }
 0xeab   :  { %3146 = vmatmul.mubr.msk.bf16.gmra.mxu0 %vm4336_vm13, %v1876_v26  ;;  %vm4343_vm13 = vmmov %vm4338_vm1 }
 0xeac   :  { %3163 = vmatprep.mubr.msk.bf16.mxu0 %vm4322_vm2, %v3531_v1 }
 0xf63   :  { %v3143_v27 = vpop.f32.mrf.mxu0 }
 0xf64   :  { %v1960_v52 = vmul.f32 0.35355338, %v3143_v27 }
 0xf65   :  { %v1927_v40 = vpop.f32.mrf.mxu0 }
 0xf66   :  { %v1958_v0 = vmul.f32 0.35355338, %v1927_v40  ;;  %v1968_v29 = vsel %vm4337_vm0, %v1960_v52, -1e+30  ;;  %vm4344_vm0 = vmmov %vm4338_vm1 }
 0xf67   :  { %v3144_v54 = vpop.f32.mrf.mxu0  ;;  %v1980_v38 = vsel %vm4338_vm1, %v1968_v29, -inf  ;;  %vm4345_vm1 = vcmp.eq.s32.totalorder %v3739_v58, %v3646_v55 }
 0xf68   :  { %v1961_v57 = vmul.f32 0.35355338, %v3144_v54  ;;  %1981 = vmax.xlane.f32.xlu1 %v1980_v38  ;;  %v1966_v61 = vsel %vm4339_vm15, %v1958_v0, -1e+30  ;;  %vm4346_vm15 = vmmov %vm4344_vm0 }
 0xf69   :  { %v1930_v51 = vpop.f32.mrf.mxu0  ;;  %v1974_v25 = vsel %vm4340_vm12, %v1966_v61, -inf  ;;  %vm4347_vm12 = vcmp.eq.s32.totalorder %v3765_v24, %v3646_v55 }
 0xf6a   :  { %v1959_v13 = vmul.f32 0.35355338, %v1930_v51  ;;  %v1969_v60 = vsel %vm4341_vm7, %v1961_v57, -1e+30  ;;  %vm4348_vm7 = vmmov %vm4344_vm0 }
 0xf6b   :  { %v3147_v31 = vpop.f32.mrf.mxu0  ;;  %v1983_v35 = vsel %vm4343_vm13, %v1969_v60, -inf  ;;  %vm4350_vm13 = vmmov %vm4344_vm0 }
 0xf6c   :  { %v1964_v3 = vmul.f32 0.35355338, %v3147_v31  ;;  %1975 = vmax.xlane.f32.xlu1 %v1974_v25  ;;  %v1967_v56 = vsel %vm4345_vm1, %v1959_v13, -1e+30  ;;  %vm4352_vm1 = vmmov %vm4348_vm7 }
 0xf6d   :  { %v1943_v28 = vpop.f32.mrf.mxu0  ;;  %v1977_v43 = vsel %vm4346_vm15, %v1967_v56, -inf  ;;  %vm4353_vm15 = vmmov %vm4352_vm1 }
 0xf6e   :  { %v1972_v37 = vsel %vm4342_vm14, %v1964_v3, -1e+30  ;;  %v1962_v59 = vmul.f32 0.35355338, %v1943_v28  ;;  %vm4349_vm14 = vcmp.eq.s32.totalorder %v3745_v63, %v3646_v55 }
 0xf6f   :  { %v3148_v4 = vpop.f32.mrf.mxu0  ;;  %v1992_v48 = vsel %vm4344_vm0, %v1972_v37, -inf  ;;  %vm4351_vm0 = vcmp.eq.s32.totalorder %v3763_v23, %v3646_v55 }
 0xf70   :  { %1984 = vmax.xlane.f32.xlu1 %v1983_v35  ;;  %1993 = vmax.xlane.f32.xlu0 %v1992_v48  ;;  %v1970_v32 = vsel %vm4347_vm12, %v1962_v59, -1e+30  ;;  %v1965_v36 = vmul.f32 0.35355338, %v3148_v4  ;;  %vm4354_vm12 = vmmov %vm4352_vm1 }
 0xf71   :  { %v1946_v44 = vpop.f32.mrf.mxu0  ;;  %v1986_v49 = vsel %vm4348_vm7, %v1970_v32, -inf  ;;  %vm4355_vm7 = vmmov %vm4352_vm1 }
 0xf72   :  { %v1963_v17 = vmul.f32 0.35355338, %v1946_v44  ;;  %v1973_v33 = vsel %vm4351_vm0, %v1965_v36, -1e+30  ;;  %vm4358_vm0 = vmmov %vm4352_vm1 }
 0xf73   :  { %v1995_v50 = vsel %vm4352_vm1, %v1973_v33, -inf }
 0xf74   :  { %1978 = vmax.xlane.f32.xlu1 %v1977_v43  ;;  %v1971_v20 = vsel %vm4349_vm14, %v1963_v17, -1e+30  ;;  %vm4356_vm14 = vmmov %vm4352_vm1 }
 0xf75   :  { %v1989_v58 = vsel %vm4350_vm13, %v1971_v20, -inf  ;;  %vm4357_vm13 = vmmov %vm4352_vm1 }
 0xf76   :  { %vm4359_vm1 = vmmov %vm4358_vm0 }
 0xf78   :  { %1987 = vmax.xlane.f32.xlu1 %v1986_v49 }
 0xf7c   :  { %1990 = vmax.xlane.f32.xlu1 %v1989_v58 }
 0xf80   :  { %1996 = vmax.xlane.f32.xlu1 %v1995_v50 }
 0xff1   :  { %v1982_v24 = vpop.xlane.xlu1 %1981 }
 0xff2   :  { %v2000_v30 = vsub.f32 %v1968_v29, %v1982_v24 }
 0xff4   :  { %v2010_v42 = vmul.f32 1.442695, %v2000_v30 }
 0xff5   :  { %v1976_v15 = vpop.xlane.xlu1 %1975 }
 0xff6   :  { %3416 = vpow2.f32 %v2010_v42  ;;  %v1998_v41 = vsub.f32 %v1966_v61, %v1976_v15 }
 0xff8   :  { %v2006_v34 = vmul.f32 1.442695, %v1998_v41 }
 0xff9   :  { %v1985_v26 = vpop.xlane.xlu1 %1984  ;;  %v1994_v63 = vpop.xlane.xlu0 %1993 }
 0xffa   :  { %3418 = vpow2.f32 %v2006_v34  ;;  %v2004_v27 = vsub.f32 %v1972_v37, %v1994_v63  ;;  %v2001_v52 = vsub.f32 %v1969_v60, %v1985_v26 }
 0xffc   :  { %v2018_v40 = vmul.f32 1.442695, %v2004_v27  ;;  %v2012_v55 = vmul.f32 1.442695, %v2001_v52 }
 0xffd   :  { %v1979_v0 = vpop.xlane.xlu1 %1978 }
 0xffe   :  { %v1999_v54 = vsub.f32 %v1967_v56, %v1979_v0  ;;  %3420 = vpow2.f32 %v2018_v40 }
0x1000   :  { %v2008_v23 = vmul.f32 1.442695, %v1999_v54 }
0x1001   :  { %v1988_v38 = vpop.xlane.xlu1 %1987 }
0x1002   :  { %3422 = vpow2.f32 %v2008_v23  ;;  %v2002_v57 = vsub.f32 %v1970_v32, %v1988_v38 }
0x1003   :  { %v4156_v29 = vpop.eup %3416  ;;  %3424 = vpow2.f32 %v2012_v55 }
0x1004   :  { %v2014_v51 = vmul.f32 1.442695, %v2002_v57  ;;  %v2028_v61 = vsel %vm4353_vm15, %v4156_v29, 0.0  ;;  %vm4360_vm15 = vmmov %vm4358_vm0 }
0x1005   :  { %2029 = vadd.xlane.f32.xlu0 %v2028_v61  ;;  %v1991_v31 = vpop.xlane.xlu1 %1990 }
0x1006   :  { %3426 = vpow2.f32 %v2014_v51  ;;  %v2003_v25 = vsub.f32 %v1971_v20, %v1991_v31 }
0x1007   :  { %v3419_v13 = vpop.eup %3418 }
0x1008   :  { %v2016_v3 = vmul.f32 1.442695, %v2003_v25  ;;  %v2022_v60 = vsel %vm4354_vm12, %v3419_v13, 0.0  ;;  %vm4361_vm12 = vmmov %vm4358_vm0 }
0x1009   :  { %2023 = vadd.xlane.f32.xlu0 %v2022_v60  ;;  %v1997_v28 = vpop.xlane.xlu1 %1996 }
0x100a   :  { %3428 = vpow2.f32 %v2016_v3  ;;  %v2005_v37 = vsub.f32 %v1973_v33, %v1997_v28 }
0x100b   :  { %v3421_v4 = vpop.eup %3420 }
0x100c   :  { %v2020_v35 = vmul.f32 1.442695, %v2005_v37  ;;  %v2040_v48 = vsel %vm4355_vm7, %v3421_v4, 0.0  ;;  %vm4362_vm7 = vmmov %vm4358_vm0 }
0x100d   :  { %2041 = vadd.xlane.f32.xlu0 %v2040_v48 }
0x100e   :  { %3430 = vpow2.f32 %v2020_v35  ;;  %v3315_v35 = vld [vmem:[#allocation2 + $0x280] sm:$0xff]  }
0x100f   :  { %v3423_v59 = vpop.eup %3422 }
0x1010   :  { %v2025_v56 = vsel %vm4356_vm14, %v3423_v59, 0.0  ;;  %v3425_v44 = vpop.eup %3424  ;;  %vm4363_vm14 = vmmov %vm4358_vm0 }
0x1011   :  { %2026 = vadd.xlane.f32.xlu1 %v2025_v56  ;;  %v2031_v32 = vsel %vm4358_vm0, %v3425_v44, 0.0 }
0x1013   :  { %v3427_v43 = vpop.eup %3426 }
0x1014   :  { %v2034_v17 = vsel %vm4357_vm13, %v3427_v43, 0.0  ;;  %vm4364_vm13 = vmmov %vm4358_vm0 }
0x1015   :  { %2035 = vadd.xlane.f32.xlu0 %v2034_v17  ;;  %2032 = vadd.xlane.f32.xlu1 %v2031_v32 }
0x1017   :  { %v3429_v49 = vpop.eup %3428 }
0x1018   :  { %v2037_v36 = vsel %vm4359_vm1, %v3429_v49, 0.0 }
0x1019   :  { %2038 = vadd.xlane.f32.xlu1 %v2037_v36 }
0x101b   :  { %v3431_v20 = vpop.eup %3430 }
0x101c   :  { %v2043_v58 = vsel %vm4360_vm15, %v3431_v20, 0.0 }
0x101d   :  { %2044 = vadd.xlane.f32.xlu1 %v2043_v58 }
0x102b   :  { %2067 = vrot.lane.b32.xlu0 %v4093_v9, %s3534_s0 }
0x108e   :  { %v2030_v33 = vpop.xlane.xlu0 %2029 }
0x1092   :  { %v2024_v50 = vpop.xlane.xlu0 %2023 }
0x1093   :  { %3432 = vrcp.f32 %v2024_v50 }
0x1096   :  { %v2042_v24 = vpop.xlane.xlu0 %2041 }
0x109a   :  { %v2027_v30 = vpop.xlane.xlu1 %2026 }
0x109b   :  { %3434 = vrcp.f32 %v2027_v30 }
0x109c   :  { %3436 = vrcp.f32 %v2030_v33 }
0x109e   :  { %v2036_v42 = vpop.xlane.xlu0 %2035  ;;  %v2033_v15 = vpop.xlane.xlu1 %2032 }
0x109f   :  { %3438 = vrcp.f32 %v2033_v15 }
0x10a0   :  { %3440 = vrcp.f32 %v2036_v42  ;;  %v3433_v9 = vpop.eup %3432 }
0x10a1   :  { %v2054_v27 = vmul.f32 %v3433_v9, %v3419_v13 }
0x10a2   :  { %v2068_v41 = vpop.permute.xlu0 %2067  ;;  %v2039_v34 = vpop.xlane.xlu1 %2038 }
0x10a3   :  { %3442 = vrcp.f32 %v2039_v34  ;;  %3149 = vmatprep.subr.bf16.mxu1 %v2068_v41 }
0x10a4   :  { %3150 = vmatpush3.bf16.msra.mxu1 %v2068_v41  ;;  %3444 = vrcp.f32 %v2042_v24 }
0x10a5   :  { %3167 = vmatprep.subr.bf16.mxu1 %v3531_v1 }
0x10a6   :  { %v2045_v26 = vpop.xlane.xlu1 %2044 }
0x10a7   :  { %3446 = vrcp.f32 %v2045_v26 }
0x10a8   :  { %v3435_v63 = vpop.eup %3434 }
0x10a9   :  { %v2055_v52 = vmul.f32 %v3435_v63, %v3423_v59  ;;  %v3437_v40 = vpop.eup %3436 }
0x10aa   :  { %v2056_v23 = vmul.f32 %v3437_v40, %v4156_v29  ;;  %v3314_v29 = vld [vmem:[#allocation2 + $0x288] sm:$0xff]   ;;  %v3316_v40 = vld [vmem:[#allocation2 + $0x2f8] sm:$0xff]  }
0x10ab   :  { %v2062_v0 = vpack.c.bf16 %v2055_v52, %v2054_v27  ;;  %3160 = vmatpush3.bf16.msra.mxu0 %v3314_v29  ;;  %v3325_v29 = vld [vmem:[#allocation2 + $0x330] sm:$0xff]  }
0x10ac   :  { %v3439_v54 = vpop.eup %3438  ;;  %3161 = vmatprep.subr.bf16.mxu0 %v3531_v1 }
0x10ad   :  { %3151 = vmatprep.mubr.msk.bf16.mxu1 %vm4361_vm12, %v2062_v0  ;;  %v3441_v55 = vpop.eup %3440  ;;  %v2057_v38 = vmul.f32 %v3439_v54, %v3425_v44 }
0x10ae   :  { %v2058_v61 = vmul.f32 %v3441_v55, %v3427_v43 }
0x10af   :  { %v2063_v51 = vpack.c.bf16 %v2057_v38, %v2056_v23  ;;  %3162 = vmatpush3.bf16.msra.mxu0 %v3315_v35  ;;  %v3326_v35 = vld [vmem:[#allocation2 + $0x328] sm:$0xff]  }
0x10b0   :  { %v3443_v57 = vpop.eup %3442  ;;  %3187 = vmatprep.subr.bf16.mxu0 %v3531_v1 }
0x10b1   :  { %v2059_v31 = vmul.f32 %v3443_v57, %v3429_v49  ;;  %v3445_v25 = vpop.eup %3444  ;;  %3152 = vmatmul.mubr.msk.bf16.vlgmr.msra.gmra.mxu1 %vm4362_vm7, %v2063_v51 }
0x10b2   :  { %v2060_v13 = vmul.f32 %v3445_v25, %v3421_v4  ;;  %3168 = vmatpush3.bf16.msra.mxu1 %v3316_v40  ;;  %v3319_v25 = vld [vmem:[#allocation2 + $0x2e0] sm:$0xff]  }
0x10b3   :  { %v2064_v3 = vpack.c.bf16 %v2059_v31, %v2058_v61  ;;  %3169 = vmatprep.subr.bf16.mxu1 %v3531_v1  ;;  %v3317_v61 = vld [vmem:[#allocation2 + $0x2f0] sm:$0xff]   ;;  %v3318_v31 = vld [vmem:[#allocation2 + $0x2e8] sm:$0xff]  }
0x10b4   :  { %v3447_v60 = vpop.eup %3446 }
0x10b5   :  { %3155 = vmatprep.mubr.msk.bf16.mxu1 %vm4363_vm14, %v2064_v3  ;;  %v2061_v28 = vmul.f32 %v3447_v60, %v3431_v20  ;;  %v3320_v3 = vld [vmem:[#allocation2 + $0x2d8] sm:$0xff]   ;;  %v3321_v60 = vld [vmem:[#allocation2 + $0x2d0] sm:$0xff]  }
0x10b6   :  { %3170 = vmatpush3.bf16.msra.mxu1 %v3317_v61 }
0x10b7   :  { %v2065_v37 = vpack.c.bf16 %v2061_v28, %v2060_v13  ;;  %3171 = vmatprep.subr.bf16.mxu1 %v3531_v1  ;;  %v3322_v13 = vld [vmem:[#allocation2 + $0x2c8] sm:$0xff]   ;;  %v3323_v28 = vld [vmem:[#allocation2 + $0x2c0] sm:$0xff]  }
0x10b9   :  { %3156 = vmatmul.mubr.msk.bf16.gmra.mxu1 %vm4364_vm13, %v2065_v37  ;;  %v3324_v37 = vld [vmem:[#allocation2 + $0x338] sm:$0xff]  }
0x10ba   :  { %3183 = vmatprep.mubr.msk.bf16.mxu1 %vm4322_vm2, %v3531_v1  ;;  %3172 = vmatpush3.bf16.msra.mxu1 %v3318_v31 }
0x10bb   :  { %3173 = vmatprep.subr.bf16.mxu1 %v3531_v1 }
0x10be   :  { %3174 = vmatpush3.bf16.msra.mxu1 %v3319_v25 }
0x10bf   :  { %3175 = vmatprep.subr.bf16.mxu1 %v3531_v1 }
0x10c2   :  { %3176 = vmatpush3.bf16.msra.mxu1 %v3320_v3 }
0x10c3   :  { %3177 = vmatprep.subr.bf16.mxu1 %v3531_v1 }
0x10c6   :  { %3178 = vmatpush3.bf16.msra.mxu1 %v3321_v60  ;;  %v3333_v60 = vld [vmem:[#allocation2 + $0x370] sm:$0xff]  }
0x10c7   :  { %3179 = vmatprep.subr.bf16.mxu1 %v3531_v1 }
0x10ca   :  { %3180 = vmatpush3.bf16.msra.mxu1 %v3322_v13  ;;  %v3334_v13 = vld [vmem:[#allocation2 + $0x368] sm:$0xff]  }
0x10cb   :  { %3181 = vmatprep.subr.bf16.mxu1 %v3531_v1 }
0x10ce   :  { %3182 = vmatpush3.bf16.msra.mxu1 %v3323_v28  ;;  %v3335_v28 = vld [vmem:[#allocation2 + $0x360] sm:$0xff]  }
0x10cf   :  { %3207 = vmatprep.subr.bf16.mxu1 %v3531_v1 }
0x1171   :  { %v3153_v48 = vpop.f32.mrf.mxu1 }
0x1172   :  { %v2149_v32 = vsel %vm3669_vm6, %v3153_v48, 0.0  ;;  %v3327_v48 = vld [vmem:[#allocation2 + $0x320] sm:$0xff]  }
0x1173   :  { %v2116_v59 = vpop.f32.mrf.mxu1 }
0x1174   :  { %v2147_v43 = vsel %vm3659_vm4, %v2116_v59, 0.0  ;;  %vm4365_vm4 = vcmask 261120   ;;  %v3328_v59 = vld [vmem:[#allocation2 + $0x318] sm:$0xff]  }
0x1175   :  { %v3154_v56 = vpop.f32.mrf.mxu1  ;;  %v2155_v20 = vadd.f32 %v2149_v32, %v2147_v43 }
0x1176   :  { %v2150_v33 = vsel %vm3689_vm10, %v3154_v56, 0.0 }
0x1177   :  { %v2119_v44 = vpop.f32.mrf.mxu1 }
0x1178   :  { %v2148_v49 = vsel %vm3679_vm8, %v2119_v44, 0.0 }
0x1179   :  { %v3157_v4 = vpop.f32.mrf.mxu1  ;;  %v2156_v50 = vadd.f32 %v2150_v33, %v2148_v49 }
0x117a   :  { %v2153_v7 = vsel %vm4324_vm3, %v3157_v4, 0.0 }
0x117b   :  { %v2132_v17 = vpop.f32.mrf.mxu1 }
0x117c   :  { %v2151_v36 = vsel %vm3664_vm5, %v2132_v17, 0.0  ;;  %vm4366_vm5 = vcmp.lt.s32.totalorder %v3594_v22, 32  ;;  %v3338_v22 = vld [vmem:[#allocation2 + $0x348] sm:$0xff]  }
0x117d   :  { %v3158_v58 = vpop.f32.mrf.mxu1  ;;  %v2157_v24 = vadd.f32 %v2155_v20, %v2151_v36  ;;  %vm4367_vm6 = vmmov %vm4366_vm5  ;;  %v2256_v36 = vrot.slane %v4198_v12, %v1118_v21  ;;  %v3330_v21 = vld [vmem:[#allocation2 + $0x308] sm:$0xff]  }
0x117e   :  { %v2154_v10 = vsel %vm4325_vm11, %v3158_v58, 0.0  ;;  %v4225_v58 = vld [vmem:[#allocation5 + $0x10] sm:$0xff]  ;;  %vm4368_vm8 = vmmov %vm4366_vm5 }
0x117f   :  { %v2135_v30 = vpop.f32.mrf.mxu1  ;;  %v2159_v6 = vadd.f32 %v2157_v24, %v2153_v7  ;;  %vm4369_vm10 = vmmov %vm4366_vm5 }
0x1180   :  { %v2152_v5 = vsel %vm4323_vm9, %v2135_v30, 0.0 }
0x1181   :  { %v2158_v42 = vadd.f32 %v2156_v50, %v2152_v5  ;;  %v2262_v50 = vrot.slane %v4225_v58, %v3620_v46  ;;  %v2286_v46 = vrot.slane %v4225_v58, %v3839_v18 }
0x1183   :  { %v2160_v15 = vadd.f32 %v2158_v42, %v2154_v10 }
0x1185   :  { %v2161_v41 = vpack.c.bf16 %v2160_v15, %v2159_v6  ;;  %v3331_v6 = vld [vmem:[#allocation2 + $0x300] sm:$0xff]  }
0x1187   :  { %3164 = vmatmul.mubr.msk.bf16.vlgmr.msra.gmra.mxu0 %vm4365_vm4, %v2161_v41 }
0x1188   :  { %3203 = vmatprep.mubr.msk.bf16.mxu0 %vm4322_vm2, %v3531_v1  ;;  %3188 = vmatpush3.bf16.msra.mxu0 %v3324_v37  ;;  %v3336_v37 = vld [vmem:[#allocation2 + $0x358] sm:$0xff]  }
0x1189   :  { %3189 = vmatprep.subr.bf16.mxu0 %v3531_v1 }
0x118c   :  { %3190 = vmatpush3.bf16.msra.mxu0 %v3325_v29  ;;  %v3337_v29 = vld [vmem:[#allocation2 + $0x350] sm:$0xff]  }
0x118d   :  { %3191 = vmatprep.subr.bf16.mxu0 %v3531_v1 }
0x1190   :  { %3192 = vmatpush3.bf16.msra.mxu0 %v3326_v35  ;;  %v3339_v35 = vld [vmem:[#allocation2 + $0x340] sm:$0xff]  }
0x1191   :  { %3193 = vmatprep.subr.bf16.mxu0 %v3531_v1 }
0x1194   :  { %3194 = vmatpush3.bf16.msra.mxu0 %v3327_v48 }
0x1195   :  { %3195 = vmatprep.subr.bf16.mxu0 %v3531_v1 }
0x1198   :  { %3196 = vmatpush3.bf16.msra.mxu0 %v3328_v59 }
0x1199   :  { %3197 = vmatprep.subr.bf16.mxu0 %v3531_v1 }
0x119c   :  { %3198 = vmatpush3.bf16.msra.mxu0 %v3329_v45 }
0x119d   :  { %3199 = vmatprep.subr.bf16.mxu0 %v3531_v1 }
0x11a0   :  { %3200 = vmatpush3.bf16.msra.mxu0 %v3330_v21 }
0x11a1   :  { %3201 = vmatprep.subr.bf16.mxu0 %v3531_v1 }
0x11a4   :  { %3202 = vmatpush3.bf16.msra.mxu0 %v3331_v6 }
0x1247   :  { %v2220_v34 = vpop.f32.mrf.mxu0 }
0x1248   :  { %v2221_v8 = vadd.f32 %v2220_v34, %v2170_v11 }
0x1249   :  { %v3165_v9 = vpop.f32.mrf.mxu0 }
0x124a   :  { %v2227_v14 = vadd.f32 %v2221_v8, %v4085_v47 }
0x124b   :  { %v2223_v26 = vpop.f32.mrf.mxu0 }
0x124c   :  { %v2224_v63 = vadd.f32 %v2223_v26, %v2170_v11  ;;  %2229 = vadd.xlane.f32.xlu1 %v2227_v14 }
0x124d   :  { %v3166_v27 = vpop.f32.mrf.mxu0 }
0x124e   :  { %v2228_v52 = vadd.f32 %v2224_v63, %v4087_v16  ;;  %v2399_v63 = vrot.slane %v4225_v58, %v3864_v62 }
0x1250   :  { %2231 = vadd.xlane.f32.xlu1 %v2228_v52 }
0x12d5   :  { %v2230_v0 = vpop.xlane.xlu1 %2229 }
0x12d6   :  { %v2233_v54 = vmul.f32 0.03125, %v2230_v0 }
0x12d8   :  { %v2235_v55 = vsub.f32 %v2227_v14, %v2233_v54 }
0x12d9   :  { %v2232_v39 = vpop.xlane.xlu1 %2231 }
0x12da   :  { %v2234_v23 = vmul.f32 0.03125, %v2232_v39  ;;  %v2237_v38 = vsel %vm4366_vm5, %v2235_v55, 0.0 }
0x12db   :  { %v2239_v47 = vmul.f32 %v2237_v38, %v2237_v38 }
0x12dc   :  { %v2236_v57 = vsub.f32 %v2228_v52, %v2234_v23  ;;  %v3332_v23 = vld [vmem:[#allocation2 + $0x378] sm:$0xff]  }
0x12dd   :  { %2241 = vadd.xlane.f32.xlu1 %v2239_v47 }
0x12de   :  { %v2238_v51 = vsel %vm4367_vm6, %v2236_v57, 0.0 }
0x12df   :  { %v2240_v16 = vmul.f32 %v2238_v51, %v2238_v51 }
0x12e1   :  { %2243 = vadd.xlane.f32.xlu1 %v2240_v16 }
0x1366   :  { %v2242_v56 = vpop.xlane.xlu1 %2241 }
0x1367   :  { %v2245_v44 = vmul.f32 0.03125, %v2242_v56 }
0x1369   :  { %v2247_v4 = vadd.f32 1e-05, %v2245_v44 }
0x136a   :  { %v2244_v43 = vpop.xlane.xlu1 %2243 }
0x136b   :  { %3448 = vrsqrt.f32 %v2247_v4  ;;  %v2246_v17 = vmul.f32 0.03125, %v2244_v43 }
0x136d   :  { %v2248_v32 = vadd.f32 1e-05, %v2246_v17 }
0x136f   :  { %3450 = vrsqrt.f32 %v2248_v32 }
0x1378   :  { %v3449_v49 = vpop.eup %3448 }
0x1379   :  { %v2251_v20 = vmul.f32 %v3449_v49, %v2237_v38  ;;  %v2518_v49 = vrot.slane %v4225_v58, %v3869_v2 }
0x137b   :  { %v2257_v30 = vmul.f32 %v2256_v36, %v2251_v20 }
0x137c   :  { %v3451_v33 = vpop.eup %3450 }
0x137d   :  { %v2252_v24 = vmul.f32 %v3451_v33, %v2238_v51  ;;  %v2263_v42 = vadd.f32 %v2262_v50, %v2257_v30 }
0x137f   :  { %v2258_v5 = vmul.f32 %v2256_v36, %v2252_v24 }
0x1381   :  { %v2264_v7 = vadd.f32 %v2262_v50, %v2258_v5 }
0x1383   :  { %v2265_v10 = vpack.c.bf16 %v2264_v7, %v2263_v42 }
0x1385   :  { %3184 = vmatmul.mubr.bf16.vlgmr.msra.gmra.mxu1 %v2265_v10 }
0x1386   :  { %3223 = vmatprep.mubr.msk.bf16.mxu1 %vm4322_vm2, %v3531_v1  ;;  %3208 = vmatpush3.bf16.msra.mxu1 %v3332_v23 }
0x1387   :  { %3209 = vmatprep.subr.bf16.mxu1 %v3531_v1 }
0x138a   :  { %3210 = vmatpush3.bf16.msra.mxu1 %v3333_v60 }
0x138b   :  { %3211 = vmatprep.subr.bf16.mxu1 %v3531_v1 }
0x138e   :  { %3212 = vmatpush3.bf16.msra.mxu1 %v3334_v13 }
0x138f   :  { %3213 = vmatprep.subr.bf16.mxu1 %v3531_v1 }
0x1392   :  { %3214 = vmatpush3.bf16.msra.mxu1 %v3335_v28 }
0x1393   :  { %3215 = vmatprep.subr.bf16.mxu1 %v3531_v1 }
0x1396   :  { %3216 = vmatpush3.bf16.msra.mxu1 %v3336_v37 }
0x1397   :  { %3217 = vmatprep.subr.bf16.mxu1 %v3531_v1 }
0x139a   :  { %3218 = vmatpush3.bf16.msra.mxu1 %v3337_v29 }
0x139b   :  { %3219 = vmatprep.subr.bf16.mxu1 %v3531_v1 }
0x139e   :  { %3220 = vmatpush3.bf16.msra.mxu1 %v3338_v22 }
0x139f   :  { %3221 = vmatprep.subr.bf16.mxu1 %v3531_v1  ;;  %v2524_v1 = vrot.slane %v4225_v58, %v3902_v19 }
0x13a2   :  { %3222 = vmatpush3.bf16.msra.mxu1 %v3339_v35 }
0x1445   :  { %v2369_v15 = vpop.f32.mrf.mxu1 }
0x1446   :  { %v2370_v12 = vadd.f32 %v2369_v15, %v2286_v46 }
0x1447   :  { %v3185_v41 = vpop.f32.mrf.mxu1 }
0x1448   :  { %v2376_v9 = vmax.f32 %v2370_v12, 0.0 }
0x1449   :  { %v2372_v11 = vpop.f32.mrf.mxu1 }
0x144a   :  { %v2373_v34 = vadd.f32 %v2372_v11, %v2286_v46 }
0x144b   :  { %v3186_v8 = vpop.f32.mrf.mxu1 }
0x144c   :  { %v2377_v14 = vmax.f32 %v2373_v34, 0.0 }
0x144e   :  { %v2378_v26 = vpack.c.bf16 %v2377_v14, %v2376_v9 }
0x1450   :  { %3204 = vmatmul.mubr.bf16.vlgmr.msra.gmra.mxu0 %v2378_v26 }
0x1510   :  { %v2482_v27 = vpop.f32.mrf.mxu0 }
0x1511   :  { %v2483_v52 = vadd.f32 %v2482_v27, %v2399_v63 }
0x1512   :  { %v3205_v40 = vpop.f32.mrf.mxu0 }
0x1513   :  { %v2489_v0 = vadd.f32 %v2483_v52, %v2263_v42  ;;  %v2548_v42 = vrot.slane %v4225_v58, %v3989_v53 }
0x1514   :  { %v2485_v54 = vpop.f32.mrf.mxu0 }
0x1515   :  { %v2486_v55 = vadd.f32 %v2485_v54, %v2399_v63  ;;  %2491 = vadd.xlane.f32.xlu1 %v2489_v0 }
0x1516   :  { %v3206_v18 = vpop.f32.mrf.mxu0 }
0x1517   :  { %v2490_v39 = vadd.f32 %v2486_v55, %v2264_v7 }
0x1519   :  { %2493 = vadd.xlane.f32.xlu1 %v2490_v39 }
0x159e   :  { %v2492_v38 = vpop.xlane.xlu1 %2491 }
0x159f   :  { %v2495_v47 = vmul.f32 0.03125, %v2492_v38 }
0x15a1   :  { %v2497_v57 = vsub.f32 %v2489_v0, %v2495_v47 }
0x15a2   :  { %v2494_v51 = vpop.xlane.xlu1 %2493 }
0x15a3   :  { %v2496_v16 = vmul.f32 0.03125, %v2494_v51  ;;  %v2499_v62 = vsel %vm4368_vm8, %v2497_v57, 0.0 }
0x15a4   :  { %v2501_v61 = vmul.f32 %v2499_v62, %v2499_v62 }
0x15a5   :  { %v2498_v31 = vsub.f32 %v2490_v39, %v2496_v16 }
0x15a6   :  { %2503 = vadd.xlane.f32.xlu0 %v2501_v61 }
0x15a7   :  { %v2500_v25 = vsel %vm4369_vm10, %v2498_v31, 0.0 }
0x15a8   :  { %v2502_v3 = vmul.f32 %v2500_v25, %v2500_v25 }
0x15aa   :  { %2505 = vadd.xlane.f32.xlu1 %v2502_v3 }
0x162f   :  { %v2504_v48 = vpop.xlane.xlu0 %2503 }
0x1630   :  { %v2507_v59 = vmul.f32 0.03125, %v2504_v48 }
0x1632   :  { %v2509_v56 = vadd.f32 1e-05, %v2507_v59 }
0x1633   :  { %v2506_v44 = vpop.xlane.xlu1 %2505 }
0x1634   :  { %3452 = vrsqrt.f32 %v2509_v56  ;;  %v2508_v4 = vmul.f32 0.03125, %v2506_v44 }
0x1636   :  { %v2510_v43 = vadd.f32 1e-05, %v2508_v4 }
0x1638   :  { %3454 = vrsqrt.f32 %v2510_v43 }
0x1641   :  { %v3453_v17 = vpop.eup %3452 }
0x1642   :  { %v2513_v32 = vmul.f32 %v3453_v17, %v2499_v62 }
0x1644   :  { %v2519_v33 = vmul.f32 %v2518_v49, %v2513_v32 }
0x1645   :  { %v3455_v36 = vpop.eup %3454 }
0x1646   :  { %v2514_v20 = vmul.f32 %v3455_v36, %v2500_v25  ;;  %v2525_v24 = vadd.f32 %v2524_v1, %v2519_v33 }
0x1648   :  { %v2520_v50 = vmul.f32 %v2518_v49, %v2514_v20 }
0x164a   :  { %v2526_v30 = vadd.f32 %v2524_v1, %v2520_v50 }
0x164c   :  { %v2527_v5 = vpack.c.bf16 %v2526_v30, %v2525_v24 }
0x164e   :  { %3224 = vmatmul.mubr.bf16.vlgmr.msra.gmra.mxu1 %v2527_v5 }
0x170e   :  { %v2631_v7 = vpop.f32.mrf.mxu1 }
0x170f   :  { %v2632_v10 = vadd.f32 %v2631_v7, %v2548_v42 }
0x1710   :  { %v3225_v45 = vpop.f32.mrf.mxu1 }
0x1711   :  { %2638 = vst [vmem:[#allocation7] sm:$0xff] %v2632_v10 }
0x1712   :  { %v2634_v2 = vpop.f32.mrf.mxu1 }
0x1713   :  { %v2635_v21 = vadd.f32 %v2634_v2, %v2548_v42 }
0x1714   :  { %v3226_v6 = vpop.f32.mrf.mxu1 }
0x1715   :  { %2639 = vst [vmem:[#allocation7 + $0x8] sm:$0xff] %v2635_v21 }
0x1716   :  { %3509 = shalt.err (!%p3506_p0)
}
0x1717   :  { %2651 = dma.vmem_to_hbm [thread:$0]  %s2646_s29, 256, %s4263_s3, [#allocation4], %s3528_s22, %s3528_s22, %s3529_s23  }
0x1718   :  { %3522 = dma.done.wait [#allocation4], 256  }
0x1719   :  { %3523 = vsyncadd [#allocation4], 4294967040 }
0x171a   :  { %2655 = vsyncpa [#allocation3], 1 }
0x171b   :  { %2656 = vsyncpa [#allocation6], 1 }
0x171c   :  { %2657 = vsyncpa [#allocation4], 1 }

</bundles_post_ra>
